<compile_context>
chip_gen: v5e
topology: v5e:2x2
jax: 0.10.0
libtpu: 0.0.40
codegen_flags: <defaults>
</compile_context>

<pallas_src>
import functools

import jax
import jax.numpy as jnp
from jax.experimental import pallas as pl
from jax.experimental.pallas import tpu as pltpu


def _depthwise_3x3(xp_ref, dww_ref, dwb_ref, H, W):
    """3x3 depthwise conv (stride 1) over a zero-padded image tile held in VMEM.

    xp_ref : (H+2, W+2, C) padded input tile
    dww_ref: (9, C)        per-channel taps, row k corresponds to (dy, dx) = (k // 3, k % 3)
    dwb_ref: (1, C)        depthwise bias
    returns (H, W, C) float32
    """
    C = dww_ref.shape[1]
    xp = xp_ref[...].astype(jnp.float32)            # load once; 9 static shifted views below
    acc = jnp.zeros((H, W, C), jnp.float32)
    for dy in range(3):                             # statically unrolled: 9 lane-wise VPU MACs
        for dx in range(3):
            tap = xp[dy:dy + H, dx:dx + W, :]
            w = dww_ref[pl.ds(dy * 3 + dx, 1), :].astype(jnp.float32).reshape(1, 1, C)
            acc = acc + tap * w
    return acc + dwb_ref[...].astype(jnp.float32).reshape(1, 1, C)


def _dw_pw_bn_relu_kernel(xp_ref, dww_ref, dwb_ref, pww_ref, pwb_ref,
                          scale_ref, shift_ref, o_ref, *, H, W):
    acc = _depthwise_3x3(xp_ref, dww_ref, dwb_ref, H, W)          # (H, W, C_in) f32
    C_in = acc.shape[-1]
    C_out = o_ref.shape[-1]
    # Pointwise 1x1 conv == matmul on the MXU: native-dtype operands, f32 accumulation.
    h2 = acc.reshape(H * W, C_in).astype(pww_ref.dtype)
    y = jnp.dot(h2, pww_ref[...], preferred_element_type=jnp.float32)
    y = y + pwb_ref[...].astype(jnp.float32)
    y = y * scale_ref[...] + shift_ref[...]                       # folded inference BatchNorm
    y = jnp.maximum(y, 0.0)                                       # ReLU
    o_ref[...] = y.reshape(H, W, C_out).astype(o_ref.dtype)


def _dw_bn_relu_kernel(xp_ref, dww_ref, dwb_ref, scale_ref, shift_ref, o_ref, *, H, W):
    acc = _depthwise_3x3(xp_ref, dww_ref, dwb_ref, H, W)          # (H, W, C) f32
    C = acc.shape[-1]
    y = acc.reshape(H * W, C)
    y = y * scale_ref[...] + shift_ref[...]                       # folded inference BatchNorm
    y = jnp.maximum(y, 0.0)                                       # ReLU
    o_ref[...] = y.reshape(H, W, C).astype(o_ref.dtype)


def depthwise_conv_block(x, params, *, pointwise=True, eps=1e-5):
    """x: (B, H, W, C_in) NHWC -> (B, H, W, C_out).

    params = (dw_w, dw_b, pw_w, pw_b, bn_gamma, bn_beta, bn_mean, bn_var)
      dw_w : (3, 3, C_in)   depthwise taps (torch weight (C_in, 1, 3, 3) -> HW,C layout)
      dw_b : (C_in,)
      pw_w : (C_in, C_out)  1x1 conv weight (torch (C_out, C_in, 1, 1) transposed)  [pointwise=True]
      pw_b : (C_out,)                                                              [pointwise=True]
      bn_* : (C_out,)       BatchNorm2d affine params + running statistics (inference mode)
    """
    dw_w, dw_b, pw_w, pw_b, gamma, beta, mean, var = params
    B, H, W, C_in = x.shape
    C_out = gamma.shape[0]
    if not pointwise:
        assert C_out == C_in, "pointwise=False path requires out_features == in_features"

    # Zero padding (padding=(1,1)) done once in the wrapper; the kernel only needs
    # static shifted views of the padded tile.
    xp = jnp.pad(x, ((0, 0), (1, 1), (1, 1), (0, 0)))

    dww2 = dw_w.reshape(9, C_in)
    dwb2 = dw_b.reshape(1, C_in)

    # Fold inference-mode BatchNorm into a per-channel scale/shift (kept in f32).
    inv_std = 1.0 / jnp.sqrt(var.astype(jnp.float32) + eps)
    scale = (gamma.astype(jnp.float32) * inv_std).reshape(1, C_out)
    shift = (beta.astype(jnp.float32)
             - mean.astype(jnp.float32) * gamma.astype(jnp.float32) * inv_std).reshape(1, C_out)

    x_spec = pl.BlockSpec((None, H + 2, W + 2, C_in), lambda b: (b, 0, 0, 0))
    out_spec = pl.BlockSpec((None, H, W, C_out), lambda b: (b, 0, 0, 0))

    def const2d(arr):  # small resident (weights / bias / BN) blocks, constant index
        return pl.BlockSpec(arr.shape, lambda b: (0, 0))

    if pointwise:
        pwb2 = pw_b.reshape(1, C_out)
        kernel = functools.partial(_dw_pw_bn_relu_kernel, H=H, W=W)
        args = (xp, dww2, dwb2, pw_w, pwb2, scale, shift)
    else:
        kernel = functools.partial(_dw_bn_relu_kernel, H=H, W=W)
        args = (xp, dww2, dwb2, scale, shift)

    in_specs = [x_spec] + [const2d(a) for a in args[1:]]

    out = pl.pallas_call(
        kernel,
        out_shape=jax.ShapeDtypeStruct((B, H, W, C_out), x.dtype),
        grid_spec=pltpu.PrefetchScalarGridSpec(
            num_scalar_prefetch=0,
            grid=(B,),
            in_specs=in_specs,
            out_specs=out_spec,
        ),
        compiler_params=pltpu.CompilerParams(
            dimension_semantics=("parallel",),
            vmem_limit_bytes=64 * 1024 * 1024,
        ),
    )(*args)
    return out


def init_depthwise_conv_block_params(key, c_in, c_out, *, pointwise=True, dtype=jnp.float32):
    """Deterministic synthetic parameters matching the PyTorch module shapes."""
    ks = jax.random.split(key, 6)
    bound_dw = 1.0 / 3.0                         # fan_in = (in_ch/groups) * kh * kw = 9
    dw_w = jax.random.uniform(ks[0], (3, 3, c_in), dtype, -bound_dw, bound_dw)
    dw_b = jax.random.uniform(ks[1], (c_in,), dtype, -bound_dw, bound_dw)
    if pointwise:
        bound_pw = 1.0 / float(jnp.sqrt(jnp.float32(c_in)))
        pw_w = jax.random.uniform(ks[2], (c_in, c_out), dtype, -bound_pw, bound_pw)
        pw_b = jax.random.uniform(ks[3], (c_out,), dtype, -bound_pw, bound_pw)
    else:
        pw_w, pw_b = None, None
    gamma = jnp.ones((c_out,), jnp.float32)
    beta = jnp.zeros((c_out,), jnp.float32)
    mean = 0.1 * jax.random.normal(ks[4], (c_out,), jnp.float32)
    var = jax.random.uniform(ks[5], (c_out,), jnp.float32, 0.5, 1.5)
    return (dw_w, dw_b, pw_w, pw_b, gamma, beta, mean, var)


def _reference(x, params, *, pointwise=True, eps=1e-5):
    """Pure-JAX reference matching the PyTorch forward (inference-mode BN)."""
    dw_w, dw_b, pw_w, pw_b, gamma, beta, mean, var = params
    C_in = x.shape[-1]
    w4 = dw_w[:, :, None, :].astype(jnp.float32)          # (3, 3, 1, C_in) HWIO, groups=C_in
    y = jax.lax.conv_general_dilated(
        x.astype(jnp.float32), w4,
        window_strides=(1, 1), padding=((1, 1), (1, 1)),
        dimension_numbers=("NHWC", "HWIO", "NHWC"),
        feature_group_count=C_in)
    y = y + dw_b.astype(jnp.float32)
    if pointwise:
        y = jnp.einsum("nhwc,co->nhwo", y, pw_w.astype(jnp.float32)) + pw_b.astype(jnp.float32)
    inv_std = 1.0 / jnp.sqrt(var.astype(jnp.float32) + eps)
    y = (y - mean.astype(jnp.float32)) * inv_std * gamma.astype(jnp.float32) + beta.astype(jnp.float32)
    y = jnp.maximum(y, 0.0)
    return y.astype(x.dtype)


if __name__ == "__main__":
    key = jax.random.PRNGKey(0)
    kx, kp1, kp2 = jax.random.split(key, 3)

    B, H, W = 2, 16, 16
    C_in, C_out = 4, 8
    x = jax.random.normal(kx, (B, H, W, C_in), jnp.float32)

    # --- depthwise 3x3 + pointwise 1x1 + BN(inference) + ReLU ---
    params = init_depthwise_conv_block_params(kp1, C_in, C_out, pointwise=True)
    out = depthwise_conv_block(x, params, pointwise=True)
    out = jax.block_until_ready(out)
    ref = _reference(x, params, pointwise=True)
    assert out.shape == (B, H, W, C_out)
    assert jnp.allclose(out, ref, atol=1e-4, rtol=1e-4), float(jnp.max(jnp.abs(out - ref)))

    # --- depthwise-only path (pointwise=False, out_features == in_features) ---
    params2 = init_depthwise_conv_block_params(kp2, C_in, C_in, pointwise=False)
    out2 = depthwise_conv_block(x, params2, pointwise=False)
    out2 = jax.block_until_ready(out2)
    ref2 = _reference(x, params2, pointwise=False)
    assert out2.shape == (B, H, W, C_in)
    assert jnp.allclose(out2, ref2, atol=1e-4, rtol=1e-4), float(jnp.max(jnp.abs(out2 - ref2)))

    print("KERNEL_OK")
</pallas_src>

<mosaic_0001>
module attributes {stable_mosaic.version = 11 : i64} {
  func.func @_dw_pw_bn_relu_kernel(%arg0: i32, %arg1: memref<1x18x18x4xf32, #tpu.memory_space<vmem>>, %arg2: memref<9x4xf32, #tpu.memory_space<vmem>>, %arg3: memref<1x4xf32, #tpu.memory_space<vmem>>, %arg4: memref<4x8xf32, #tpu.memory_space<vmem>>, %arg5: memref<1x8xf32, #tpu.memory_space<vmem>>, %arg6: memref<1x8xf32, #tpu.memory_space<vmem>>, %arg7: memref<1x8xf32, #tpu.memory_space<vmem>>, %arg8: memref<1x16x16x8xf32, #tpu.memory_space<vmem>>) attributes {dimension_semantics = [#tpu.dimension_semantics<parallel>], iteration_bounds = array<i64: 2>, scalar_prefetch = 0 : i64, scratch_operands = 0 : i64, tpu.core_type = #tpu.core_type<tc>, window_params = [{transform_indices = @transform_0, window_bounds = array<i64: 1, 18, 18, 4>}, {pipeline_mode = #tpu.pipeline_mode<synchronous>, transform_indices = @transform_1, window_bounds = array<i64: 9, 4>}, {pipeline_mode = #tpu.pipeline_mode<synchronous>, transform_indices = @transform_2, window_bounds = array<i64: 1, 4>}, {pipeline_mode = #tpu.pipeline_mode<synchronous>, transform_indices = @transform_3, window_bounds = array<i64: 4, 8>}, {pipeline_mode = #tpu.pipeline_mode<synchronous>, transform_indices = @transform_4, window_bounds = array<i64: 1, 8>}, {pipeline_mode = #tpu.pipeline_mode<synchronous>, transform_indices = @transform_5, window_bounds = array<i64: 1, 8>}, {pipeline_mode = #tpu.pipeline_mode<synchronous>, transform_indices = @transform_6, window_bounds = array<i64: 1, 8>}, {transform_indices = @transform_7, window_bounds = array<i64: 1, 16, 16, 8>}]} {
    %c0 = arith.constant 0 : index
    %c0_0 = arith.constant 0 : index
    %c0_1 = arith.constant 0 : index
    %c0_2 = arith.constant 0 : index
    %0 = vector.load %arg1[%c0, %c0_0, %c0_1, %c0_2] : memref<1x18x18x4xf32, #tpu.memory_space<vmem>>, vector<1x18x18x4xf32>
    %1 = vector.shape_cast %0 : vector<1x18x18x4xf32> to vector<18x18x4xf32>
    %cst = arith.constant 0.000000e+00 : f32
    %2 = vector.broadcast %cst : f32 to vector<16x16x4xf32>
    %3 = vector.extract_strided_slice %1 {offsets = [0, 0, 0], sizes = [16, 16, 4], strides = [1, 1, 1]} : vector<18x18x4xf32> to vector<16x16x4xf32>
    %c0_3 = arith.constant 0 : index
    %c0_4 = arith.constant 0 : index
    %4 = vector.load %arg2[%c0_3, %c0_4] : memref<9x4xf32, #tpu.memory_space<vmem>>, vector<1x4xf32>
    %5 = vector.shape_cast %4 : vector<1x4xf32> to vector<1x1x4xf32>
    %6 = vector.broadcast %5 : vector<1x1x4xf32> to vector<16x16x4xf32>
    %7 = arith.mulf %3, %6 : vector<16x16x4xf32>
    %8 = arith.addf %2, %7 : vector<16x16x4xf32>
    %9 = vector.extract_strided_slice %1 {offsets = [0, 1, 0], sizes = [16, 16, 4], strides = [1, 1, 1]} : vector<18x18x4xf32> to vector<16x16x4xf32>
    %c1 = arith.constant 1 : index
    %c0_5 = arith.constant 0 : index
    %10 = vector.load %arg2[%c1, %c0_5] : memref<9x4xf32, #tpu.memory_space<vmem>>, vector<1x4xf32>
    %11 = vector.shape_cast %10 : vector<1x4xf32> to vector<1x1x4xf32>
    %12 = vector.broadcast %11 : vector<1x1x4xf32> to vector<16x16x4xf32>
    %13 = arith.mulf %9, %12 : vector<16x16x4xf32>
    %14 = arith.addf %8, %13 : vector<16x16x4xf32>
    %15 = vector.extract_strided_slice %1 {offsets = [0, 2, 0], sizes = [16, 16, 4], strides = [1, 1, 1]} : vector<18x18x4xf32> to vector<16x16x4xf32>
    %c2 = arith.constant 2 : index
    %c0_6 = arith.constant 0 : index
    %16 = vector.load %arg2[%c2, %c0_6] : memref<9x4xf32, #tpu.memory_space<vmem>>, vector<1x4xf32>
    %17 = vector.shape_cast %16 : vector<1x4xf32> to vector<1x1x4xf32>
    %18 = vector.broadcast %17 : vector<1x1x4xf32> to vector<16x16x4xf32>
    %19 = arith.mulf %15, %18 : vector<16x16x4xf32>
    %20 = arith.addf %14, %19 : vector<16x16x4xf32>
    %21 = vector.extract_strided_slice %1 {offsets = [1, 0, 0], sizes = [16, 16, 4], strides = [1, 1, 1]} : vector<18x18x4xf32> to vector<16x16x4xf32>
    %c3 = arith.constant 3 : index
    %c0_7 = arith.constant 0 : index
    %22 = vector.load %arg2[%c3, %c0_7] : memref<9x4xf32, #tpu.memory_space<vmem>>, vector<1x4xf32>
    %23 = vector.shape_cast %22 : vector<1x4xf32> to vector<1x1x4xf32>
    %24 = vector.broadcast %23 : vector<1x1x4xf32> to vector<16x16x4xf32>
    %25 = arith.mulf %21, %24 : vector<16x16x4xf32>
    %26 = arith.addf %20, %25 : vector<16x16x4xf32>
    %27 = vector.extract_strided_slice %1 {offsets = [1, 1, 0], sizes = [16, 16, 4], strides = [1, 1, 1]} : vector<18x18x4xf32> to vector<16x16x4xf32>
    %c4 = arith.constant 4 : index
    %c0_8 = arith.constant 0 : index
    %28 = vector.load %arg2[%c4, %c0_8] : memref<9x4xf32, #tpu.memory_space<vmem>>, vector<1x4xf32>
    %29 = vector.shape_cast %28 : vector<1x4xf32> to vector<1x1x4xf32>
    %30 = vector.broadcast %29 : vector<1x1x4xf32> to vector<16x16x4xf32>
    %31 = arith.mulf %27, %30 : vector<16x16x4xf32>
    %32 = arith.addf %26, %31 : vector<16x16x4xf32>
    %33 = vector.extract_strided_slice %1 {offsets = [1, 2, 0], sizes = [16, 16, 4], strides = [1, 1, 1]} : vector<18x18x4xf32> to vector<16x16x4xf32>
    %c5 = arith.constant 5 : index
    %c0_9 = arith.constant 0 : index
    %34 = vector.load %arg2[%c5, %c0_9] : memref<9x4xf32, #tpu.memory_space<vmem>>, vector<1x4xf32>
    %35 = vector.shape_cast %34 : vector<1x4xf32> to vector<1x1x4xf32>
    %36 = vector.broadcast %35 : vector<1x1x4xf32> to vector<16x16x4xf32>
    %37 = arith.mulf %33, %36 : vector<16x16x4xf32>
    %38 = arith.addf %32, %37 : vector<16x16x4xf32>
    %39 = vector.extract_strided_slice %1 {offsets = [2, 0, 0], sizes = [16, 16, 4], strides = [1, 1, 1]} : vector<18x18x4xf32> to vector<16x16x4xf32>
    %c6 = arith.constant 6 : index
    %c0_10 = arith.constant 0 : index
    %40 = vector.load %arg2[%c6, %c0_10] : memref<9x4xf32, #tpu.memory_space<vmem>>, vector<1x4xf32>
    %41 = vector.shape_cast %40 : vector<1x4xf32> to vector<1x1x4xf32>
    %42 = vector.broadcast %41 : vector<1x1x4xf32> to vector<16x16x4xf32>
    %43 = arith.mulf %39, %42 : vector<16x16x4xf32>
    %44 = arith.addf %38, %43 : vector<16x16x4xf32>
    %45 = vector.extract_strided_slice %1 {offsets = [2, 1, 0], sizes = [16, 16, 4], strides = [1, 1, 1]} : vector<18x18x4xf32> to vector<16x16x4xf32>
    %c7 = arith.constant 7 : index
    %c0_11 = arith.constant 0 : index
    %46 = vector.load %arg2[%c7, %c0_11] : memref<9x4xf32, #tpu.memory_space<vmem>>, vector<1x4xf32>
    %47 = vector.shape_cast %46 : vector<1x4xf32> to vector<1x1x4xf32>
    %48 = vector.broadcast %47 : vector<1x1x4xf32> to vector<16x16x4xf32>
    %49 = arith.mulf %45, %48 : vector<16x16x4xf32>
    %50 = arith.addf %44, %49 : vector<16x16x4xf32>
    %51 = vector.extract_strided_slice %1 {offsets = [2, 2, 0], sizes = [16, 16, 4], strides = [1, 1, 1]} : vector<18x18x4xf32> to vector<16x16x4xf32>
    %c8 = arith.constant 8 : index
    %c0_12 = arith.constant 0 : index
    %52 = vector.load %arg2[%c8, %c0_12] : memref<9x4xf32, #tpu.memory_space<vmem>>, vector<1x4xf32>
    %53 = vector.shape_cast %52 : vector<1x4xf32> to vector<1x1x4xf32>
    %54 = vector.broadcast %53 : vector<1x1x4xf32> to vector<16x16x4xf32>
    %55 = arith.mulf %51, %54 : vector<16x16x4xf32>
    %56 = arith.addf %50, %55 : vector<16x16x4xf32>
    %c0_13 = arith.constant 0 : index
    %c0_14 = arith.constant 0 : index
    %57 = vector.load %arg3[%c0_13, %c0_14] : memref<1x4xf32, #tpu.memory_space<vmem>>, vector<1x4xf32>
    %58 = vector.shape_cast %57 : vector<1x4xf32> to vector<1x1x4xf32>
    %59 = vector.broadcast %58 : vector<1x1x4xf32> to vector<16x16x4xf32>
    %60 = arith.addf %56, %59 : vector<16x16x4xf32>
    %61 = vector.shape_cast %60 : vector<16x16x4xf32> to vector<256x4xf32>
    %c0_15 = arith.constant 0 : index
    %c0_16 = arith.constant 0 : index
    %62 = vector.load %arg4[%c0_15, %c0_16] : memref<4x8xf32, #tpu.memory_space<vmem>>, vector<4x8xf32>
    %cst_17 = arith.constant dense<0.000000e+00> : vector<256x8xf32>
    %63 = tpu.matmul %61, %62, %cst_17 {dimension_numbers = #tpu.dot_dimension_numbers<[1], [0], [0], [1], [0, 0, 1, 1], [], []>} : vector<256x4xf32>, vector<4x8xf32>, vector<256x8xf32> -> vector<256x8xf32>
    %c0_18 = arith.constant 0 : index
    %c0_19 = arith.constant 0 : index
    %64 = vector.load %arg5[%c0_18, %c0_19] : memref<1x8xf32, #tpu.memory_space<vmem>>, vector<1x8xf32>
    %65 = vector.broadcast %64 : vector<1x8xf32> to vector<256x8xf32>
    %66 = arith.addf %63, %65 : vector<256x8xf32>
    %c0_20 = arith.constant 0 : index
    %c0_21 = arith.constant 0 : index
    %67 = vector.load %arg6[%c0_20, %c0_21] : memref<1x8xf32, #tpu.memory_space<vmem>>, vector<1x8xf32>
    %68 = vector.broadcast %67 : vector<1x8xf32> to vector<256x8xf32>
    %69 = arith.mulf %66, %68 : vector<256x8xf32>
    %c0_22 = arith.constant 0 : index
    %c0_23 = arith.constant 0 : index
    %70 = vector.load %arg7[%c0_22, %c0_23] : memref<1x8xf32, #tpu.memory_space<vmem>>, vector<1x8xf32>
    %71 = vector.broadcast %70 : vector<1x8xf32> to vector<256x8xf32>
    %72 = arith.addf %69, %71 : vector<256x8xf32>
    %cst_24 = arith.constant 0.000000e+00 : f32
    %73 = vector.broadcast %cst_24 : f32 to vector<256x8xf32>
    %74 = arith.maximumf %72, %73 : vector<256x8xf32>
    %75 = vector.shape_cast %74 : vector<256x8xf32> to vector<16x16x8xf32>
    %c0_25 = arith.constant 0 : index
    %c0_26 = arith.constant 0 : index
    %c0_27 = arith.constant 0 : index
    %c0_28 = arith.constant 0 : index
    %76 = vector.load %arg8[%c0_25, %c0_26, %c0_27, %c0_28] : memref<1x16x16x8xf32, #tpu.memory_space<vmem>>, vector<1x16x16x8xf32>
    %77 = vector.shape_cast %76 : vector<1x16x16x8xf32> to vector<16x16x8xf32>
    %78 = vector.shape_cast %75 : vector<16x16x8xf32> to vector<1x16x16x8xf32>
    tpu.vector_store %arg8[%c0_25, %c0_26, %c0_27, %c0_28], %78 {strides = array<i32>} : memref<1x16x16x8xf32, #tpu.memory_space<vmem>>, vector<1x16x16x8xf32>,
    return
  }
  func.func @transform_0(%arg0: i32) -> (i32, i32, i32, i32) {
    %c0_i32 = arith.constant 0 : i32
    %c0_i32_0 = arith.constant 0 : i32
    %c0_i32_1 = arith.constant 0 : i32
    %c0_i32_2 = arith.constant 0 : i32
    return %arg0, %c0_i32, %c0_i32_0, %c0_i32_1 : i32, i32, i32, i32
  }
  func.func @transform_1(%arg0: i32) -> (i32, i32) {
    %c0_i32 = arith.constant 0 : i32
    %c0_i32_0 = arith.constant 0 : i32
    %c0_i32_1 = arith.constant 0 : i32
    return %c0_i32, %c0_i32_0 : i32, i32
  }
  func.func @transform_2(%arg0: i32) -> (i32, i32) {
    %c0_i32 = arith.constant 0 : i32
    %c0_i32_0 = arith.constant 0 : i32
    %c0_i32_1 = arith.constant 0 : i32
    return %c0_i32, %c0_i32_0 : i32, i32
  }
  func.func @transform_3(%arg0: i32) -> (i32, i32) {
    %c0_i32 = arith.constant 0 : i32
    %c0_i32_0 = arith.constant 0 : i32
    %c0_i32_1 = arith.constant 0 : i32
    return %c0_i32, %c0_i32_0 : i32, i32
  }
  func.func @transform_4(%arg0: i32) -> (i32, i32) {
    %c0_i32 = arith.constant 0 : i32
    %c0_i32_0 = arith.constant 0 : i32
    %c0_i32_1 = arith.constant 0 : i32
    return %c0_i32, %c0_i32_0 : i32, i32
  }
  func.func @transform_5(%arg0: i32) -> (i32, i32) {
    %c0_i32 = arith.constant 0 : i32
    %c0_i32_0 = arith.constant 0 : i32
    %c0_i32_1 = arith.constant 0 : i32
    return %c0_i32, %c0_i32_0 : i32, i32
  }
  func.func @transform_6(%arg0: i32) -> (i32, i32) {
    %c0_i32 = arith.constant 0 : i32
    %c0_i32_0 = arith.constant 0 : i32
    %c0_i32_1 = arith.constant 0 : i32
    return %c0_i32, %c0_i32_0 : i32, i32
  }
  func.func @transform_7(%arg0: i32) -> (i32, i32, i32, i32) {
    %c0_i32 = arith.constant 0 : i32
    %c0_i32_0 = arith.constant 0 : i32
    %c0_i32_1 = arith.constant 0 : i32
    %c0_i32_2 = arith.constant 0 : i32
    return %arg0, %c0_i32, %c0_i32_0, %c0_i32_1 : i32, i32, i32, i32
  }
}

</mosaic_0001>

<bundles_post_ra>
// kernel: tpu_custom_call.1
= control target key start
LH: loop header
LB: loop body
LE: loop exit
PB: predicated region body
PF: predicated region fallthrough
CT: control target
= control target key end

     0   :  { %s2611_s24 = smov 0   ;;  %s4825_s0 = inlined_call_operand.vmem [shape: f32[2,18,18,4], index: 0, kind: input, shape index: {}]   ;;  %s4826_s1 = inlined_call_operand.vmem [shape: f32[9,4], index: 1, kind: input, shape index: {}]   ;;  %s4827_s2 = inlined_call_operand.vmem [shape: f32[1,4], index: 2, kind: input, shape index: {}]   ;;  %s4828_s3 = inlined_call_operand.vmem [shape: f32[4,8], index: 3, kind: input, shape index: {}]   ;;  %s4829_s4 = inlined_call_operand.vmem [shape: f32[1,8], index: 4, kind: input, shape index: {}]   ;;  %s4830_s5 = inlined_call_operand.vmem [shape: f32[1,8], index: 5, kind: input, shape index: {}]   ;;  %s4831_s6 = inlined_call_operand.vmem [shape: f32[1,8], index: 6, kind: input, shape index: {}]   ;;  %s4832_s7 = inlined_call_operand.vmem [shape: f32[2,16,16,8], index: 7, kind: output, shape index: {}]  }
   0x1 LB: > { %s2432_s25 = sadd.s32 4294967295, %s2569_s24   ;;  %p2436_p0 = scmp.ge.s32.totalorder %s2569_s24, 1  ;;  %s2569_s24 = sphi %s2611_s24, %s17_s24  }
   0x2   : > { %p237_p1 = scmp.lt.s32.totalorder %s2569_s24, 3 }
   0x4   : > { %p238_p2 = pnand %p2436_p0, %p237_p1 }
   0x6   : > { %241 = sbr.rel (%p238_p2) target bundleno = 477 (0x1dd), region = 48 }
   0xb   : > { %v2021_v0 = vld [vmem:[%s4828_s3] sm:$0xf]  ;;  %vm2123_vm0 = vcmask 1043456   ;;  %p269_p3 = scmp.lt.s32.totalorder %s2432_s25, 1  ;;  %v2648_v5 = vld [vmem:[%s4826_s1 + $0x4] ss:$0 sm:$0xff] }
   0xc   : > { %2477 = vmatpush.msk.msra.mxu2 %vm2123_vm0, %v2021_v0  ;;  %2478 = vmatpush.msk.msra.mxu3 %vm2123_vm0, %v2021_v0  ;;  %v2627_v1 = vld [vmem:[%s4826_s1] ss:$0 sm:$0xff]  ;;  %v2632_v2 = vld [vmem:[%s4826_s1 + $0x1] ss:$0 sm:$0xff]  ;;  %v2637_v3 = vld [vmem:[%s4826_s1 + $0x2] ss:$0 sm:$0xff] }
   0xd   : > { %s5212_s25 = smov (!%p269_p3, %s2432_s25), 1  ;;  %2440 = vmatpush.msk.msra.mxu0 %vm2123_vm0, %v2021_v0  ;;  %2476 = vmatpush.msk.msra.mxu1 %vm2123_vm0, %v2021_v0  ;;  %v2643_v4 = vld [vmem:[%s4826_s1 + $0x3] ss:$0 sm:$0xff]  ;;  %v2658_v6 = vld [vmem:[%s4826_s1 + $0x5] ss:$0 sm:$0xff]  ;;  %vm497_vm1 = vcmask 1046528  }
   0xe   : > { %s2479_s11 = smul.u32 432, %s5212_s25  ;;  %vm740_vm2 = vcmask 1045504   ;;  %v2680_v15 = vld [vmem:[%s4826_s1 + $0x6] ss:$0 sm:$0xff]  ;;  %v2685_v16 = vld [vmem:[%s4826_s1 + $0x7] ss:$0 sm:$0xff] }
   0xf   : > { %v2708_v26 = vld [vmem:[%s4826_s1 + $0x8] ss:$0 sm:$0xff]  ;;  %vm2026_vm3 = vcmask 31744   ;;  %vm2344_vm4 = vcmask 64512   ;;  %s2475_s13 = sshll.u32 %s5212_s25, 8 }
  0x10   : > { %s2653_s18 = scalar_lea.vmem %s4825_s0, %s2479_s11  ;;  %s4662_s15 = scalar_lea.vmem %s4832_s7, %s2475_s13 }
  0x11   : > { %v303_v7 = vld [vmem:[%s2653_s18 + $0xc0] sm:$0xff]  ;;  %v2662_v8 = vld [vmem:[%s2653_s18 + $0xc8] sm:$0xff]  ;;  %v2665_v9 = vld [vmem:[%s2653_s18 + $0xd8] sm:$0xff] }
  0x12   : > { %5009 = vst [vmem:[#allocation2_spill] sm:$0xff] %v2665_v9  ;;  %v2668_v10 = vld [vmem:[%s2653_s18 + $0xe0] sm:$0xff]  ;;  %v351_v11 = vmul.f32 %v2627_v1, %v303_v7  ;;  %v425_v12 = vmul.f32 %v2632_v2, %v303_v7  ;;  %v2674_v13 = vmul.f32 %v2632_v2, %v2662_v8  ;;  %v668_v14 = vmul.f32 %v2637_v3, %v303_v7  ;;  %v2688_v17 = vld [vmem:[%s2653_s18 + $0xf0] sm:$0xff]  ;;  %v2711_v27 = vld [vmem:[%s2653_s18 + $0xf8] sm:$0xff] }
  0x13   : > { %5010 = vst [vmem:[#allocation3_spill] sm:$0xff] %v2668_v10  ;;  %v2692_v18 = vmul.f32 %v2637_v3, %v2662_v8  ;;  %v903_v19 = vmul.f32 %v2643_v4, %v2665_v9  ;;  %v977_v20 = vmul.f32 %v2648_v5, %v2665_v9  ;;  %v2700_v21 = vmul.f32 %v2648_v5, %v2668_v10  ;;  %v315_v36 = vld [vmem:[%s2653_s18 + $0x120] sm:$0xff]  ;;  %v2735_v41 = vld [vmem:[%s2653_s18 + $0x128] sm:$0xff]  ;;  %v2751_v48 = vld [vmem:[%s2653_s18 + $0x138] sm:$0xff] }
  0x14   : > { %5011 = vst [vmem:[#allocation4_spill] sm:$0xff] %v2688_v17  ;;  %v538_v22 = vrot.slane %v425_v12, 1  ;;  %v4848_v23 = vrot.slane %v2674_v13, 1  ;;  %v781_v24 = vrot.slane %v668_v14, 2  ;;  %v1219_v25 = vmul.f32 %v2658_v6, %v2665_v9  ;;  %v2762_v56 = vld [vmem:[%s2653_s18 + $0x140] sm:$0xff]  ;;  %v2779_v7 = vld [vmem:[%s2653_s18 + $0x150] sm:$0xff] }
  0x15   : > { %5012 = vst [vmem:[#allocation5_spill] sm:$0xff] %v2711_v27  ;;  %v4847_v28 = vrot.slane %v2692_v18, 2  ;;  %v1089_v29 = vrot.slane %v977_v20, 1  ;;  %v4846_v30 = vrot.slane %v2700_v21, 1  ;;  %v2717_v31 = vmul.f32 %v2658_v6, %v2668_v10 }
  0x16   : > { %v540_v32 = vsel %vm497_vm1, %v538_v22, %v4848_v23  ;;  %v1331_v33 = vrot.slane %v1219_v25, 2  ;;  %v1453_v34 = vmul.f32 %v2680_v15, %v2688_v17  ;;  %v1527_v35 = vmul.f32 %v2685_v16, %v2688_v17  ;;  %5013 = vst [vmem:[#allocation6_spill] sm:$0xff] %v2751_v48 }
  0x17   : > { %v626_v37 = vadd.f32 %v540_v32, %v351_v11  ;;  %v783_v38 = vsel %vm740_vm2, %v781_v24, %v4847_v28  ;;  %v1091_v39 = vsel %vm497_vm1, %v1089_v29, %v4846_v30  ;;  %v4845_v40 = vrot.slane %v2717_v31, 2  ;;  %5014 = vst [vmem:[#allocation7_spill] sm:$0xff] %v2779_v7 }
  0x18   : > { %v2739_v42 = vmul.f32 %v2685_v16, %v2711_v27  ;;  %v1639_v43 = vrot.slane %v1527_v35, 1  ;;  %v1769_v44 = vmul.f32 %v2708_v26, %v2688_v17  ;;  %v2745_v45 = vmul.f32 %v2708_v26, %v2711_v27 }
  0x19   : > { %v869_v46 = vadd.f32 %v783_v38, %v626_v37  ;;  %v1333_v47 = vsel %vm740_vm2, %v1331_v33, %v4845_v40  ;;  %v359_v49 = vmul.f32 %v2627_v1, %v315_v36  ;;  %v437_v50 = vmul.f32 %v2632_v2, %v315_v36 }
  0x1a   : > { %v4841_v51 = vrot.slane %v2739_v42, 1  ;;  %v1881_v52 = vrot.slane %v1769_v44, 2  ;;  %v4839_v53 = vrot.slane %v2745_v45, 2  ;;  %v2759_v54 = vmul.f32 %v2632_v2, %v2735_v41 }
  0x1b   : > { %v935_v55 = vadd.f32 %v903_v19, %v869_v46  ;;  %v558_v57 = vrot.slane %v437_v50, 1  ;;  %v680_v58 = vmul.f32 %v2637_v3, %v315_v36  ;;  %v2767_v59 = vmul.f32 %v2637_v3, %v2735_v41  ;;  %v2785_v19 = vld [vmem:[%s2653_s18 + $0x158] sm:$0xff] }
  0x1c   : > { %v1641_v60 = vsel %vm497_vm1, %v1639_v43, %v4841_v51  ;;  %v1883_v61 = vsel %vm740_vm2, %v1881_v52, %v4839_v53  ;;  %v4838_v62 = vrot.slane %v2759_v54, 1  ;;  %v911_v63 = vmul.f32 %v2643_v4, %v2751_v48 }
  0x1d   : > { %v1177_v0 = vadd.f32 %v1091_v39, %v935_v55  ;;  %v801_v11 = vrot.slane %v680_v58, 2  ;;  %v4837_v12 = vrot.slane %v2767_v59, 2  ;;  %v989_v14 = vmul.f32 %v2648_v5, %v2751_v48 }
  0x1e   : > { %v560_v20 = vsel %vm497_vm1, %v558_v57, %v4838_v62  ;;  %v2792_v22 = vmul.f32 %v2648_v5, %v2762_v56  ;;  %v1231_v24 = vmul.f32 %v2658_v6, %v2751_v48  ;;  %v2798_v25 = vmul.f32 %v2658_v6, %v2762_v56  ;;  %v2827_v57 = vld [vmem:[%s2653_s18 + $0x8] sm:$0xff] }
  0x1f   : > { %v1419_v29 = vadd.f32 %v1333_v47, %v1177_v0  ;;  %v634_v32 = vadd.f32 %v560_v20, %v359_v49  ;;  %v803_v33 = vsel %vm740_vm2, %v801_v11, %v4837_v12  ;;  %v1109_v35 = vrot.slane %v989_v14, 1  ;;  %v279_v49 = vld [vmem:[%s2653_s18] sm:$0xff] }
  0x20   : > { %v4835_v36 = vrot.slane %v2792_v22, 1  ;;  %v1351_v37 = vrot.slane %v1231_v24, 2  ;;  %v4833_v38 = vrot.slane %v2798_v25, 2  ;;  %v1461_v39 = vmul.f32 %v2680_v15, %v2779_v7  ;;  %v2832_v0 = vld [vmem:[%s4827_s2] ss:$0 sm:$0xff] }
  0x21   : > { %v1485_v43 = vadd.f32 %v1453_v34, %v1419_v29  ;;  %v877_v44 = vadd.f32 %v803_v33, %v634_v32  ;;  %v1539_v46 = vmul.f32 %v2685_v16, %v2779_v7  ;;  %v2811_v47 = vmul.f32 %v2685_v16, %v2785_v19  ;;  %v2837_v32 = vld [vmem:[%s2653_s18 + $0x18] sm:$0xff] }
  0x22   : > { %v1111_v50 = vsel %vm497_vm1, %v1109_v35, %v4835_v36  ;;  %v1353_v52 = vsel %vm740_vm2, %v1351_v37, %v4833_v38  ;;  %v1781_v34 = vmul.f32 %v2708_v26, %v2779_v7  ;;  %v2824_v55 = vmul.f32 %v2708_v26, %v2785_v19  ;;  %5015 = vst [vmem:[#allocation8_spill] sm:$0xff] %v2837_v32 }
  0x23   : > { %v1727_v58 = vadd.f32 %v1641_v60, %v1485_v43  ;;  %v943_v11 = vadd.f32 %v911_v63, %v877_v44  ;;  %v1659_v14 = vrot.slane %v1539_v46, 1  ;;  %v4834_v20 = vrot.slane %v2811_v47, 1  ;;  %v2845_v63 = vld [vmem:[%s2653_s18 + $0x20] sm:$0xff] }
  0x24   : > { %v1901_v24 = vrot.slane %v1781_v34, 2  ;;  %v4836_v29 = vrot.slane %v2824_v55, 2  ;;  %v335_v33 = vmul.f32 %v2627_v1, %v279_v49  ;;  %v401_v35 = vmul.f32 %v2632_v2, %v279_v49 }
  0x25   : > { %v1969_v60 = vadd.f32 %v1883_v61, %v1727_v58  ;;  %v1185_v37 = vadd.f32 %v1111_v50, %v943_v11  ;;  %v1661_v43 = vsel %vm497_vm1, %v1659_v14, %v4834_v20  ;;  %v2849_v44 = vmul.f32 %v2632_v2, %v2827_v57  ;;  %v2864_v20 = vld [vmem:[%s2653_s18 + $0x30] sm:$0xff] }
  0x26   : > { %v1903_v46 = vsel %vm740_vm2, %v1901_v24, %v4836_v29  ;;  %v498_v34 = vrot.slane %v401_v35, 1  ;;  %v644_v38 = vmul.f32 %v2637_v3, %v279_v49  ;;  %v2857_v61 = vmul.f32 %v2637_v3, %v2827_v57  ;;  %5016 = vst [vmem:[#allocation9_spill] sm:$0xff] %v2864_v20 }
  0x27   : > { %v2005_v50 = vadd.f32 %v2832_v0, %v1969_v60  ;;  %v1427_v58 = vadd.f32 %v1353_v52, %v1185_v37  ;;  %v4840_v11 = vrot.slane %v2849_v44, 1  ;;  %v887_v14 = vmul.f32 %v2643_v4, %v2837_v32  ;;  %v2875_v60 = vld [vmem:[%s2653_s18 + $0x38] sm:$0xff] }
  0x28   : > { %v741_v36 = vrot.slane %v644_v38, 2  ;;  %v4843_v24 = vrot.slane %v2857_v61, 2  ;;  %v953_v49 = vmul.f32 %v2648_v5, %v2837_v32  ;;  %v2871_v35 = vmul.f32 %v2648_v5, %v2845_v63 }
  0x29   : > { %2457 = vmatmul.msk.f32.vlgmr.msra.gmra.mxu2 %vm2026_vm3, %v2005_v50  ;;  %v1493_v52 = vadd.f32 %v1461_v39, %v1427_v58  ;;  %v500_v37 = vsel %vm497_vm1, %v498_v34, %v4840_v11  ;;  %v1195_v38 = vmul.f32 %v2658_v6, %v2837_v32  ;;  %v2884_v29 = vmul.f32 %v2658_v6, %v2845_v63  ;;  %v2951_v32 = vld [vmem:[%s2653_s18 + $0x98] sm:$0xff] }
  0x2a   : > { %v610_v12 = vadd.f32 %v500_v37, %v335_v33  ;;  %v743_v50 = vsel %vm740_vm2, %v741_v36, %v4843_v24  ;;  %v1049_v39 = vrot.slane %v953_v49, 1  ;;  %v4842_v58 = vrot.slane %v2871_v35, 1  ;;  %5021 = vst [vmem:[#allocation14_spill] sm:$0xff] %v2951_v32 }
  0x2b   : > { %v1735_v62 = vadd.f32 %v1661_v43, %v1493_v52  ;;  %v1291_v53 = vrot.slane %v1195_v38, 2  ;;  %v4844_v34 = vrot.slane %v2884_v29, 2  ;;  %v1437_v11 = vmul.f32 %v2680_v15, %v2864_v20  ;;  %v291_v43 = vld [vmem:[%s2653_s18 + $0x60] sm:$0xff] }
  0x2c   : > { %v853_v51 = vadd.f32 %v743_v50, %v610_v12  ;;  %v1051_v33 = vsel %vm497_vm1, %v1049_v39, %v4842_v58  ;;  %v1503_v36 = vmul.f32 %v2685_v16, %v2864_v20  ;;  %v2900_v49 = vmul.f32 %v2685_v16, %v2875_v60  ;;  %v2913_v50 = vld [vmem:[%s2653_s18 + $0x68] sm:$0xff] }
  0x2d   : > { %v1977_v52 = vadd.f32 %v1903_v46, %v1735_v62  ;;  %v1293_v37 = vsel %vm740_vm2, %v1291_v53, %v4844_v34  ;;  %v1745_v12 = vmul.f32 %v2708_v26, %v2864_v20  ;;  %v2910_v38 = vmul.f32 %v2708_v26, %v2875_v60  ;;  %v2917_v62 = vld [vmem:[%s2653_s18 + $0x78] sm:$0xff] }
  0x2e   : > { %v919_v39 = vadd.f32 %v887_v14, %v853_v51  ;;  %v1599_v58 = vrot.slane %v1503_v36, 1  ;;  %v4849_v24 = vrot.slane %v2900_v49, 1  ;;  %5018 = vst [vmem:[#allocation11_spill] sm:$0xff] %v2917_v62  ;;  %v343_v46 = vmul.f32 %v2627_v1, %v291_v43  ;;  %v2927_v14 = vld [vmem:[%s2653_s18 + $0x80] sm:$0xff] }
  0x2f   : > { %5017 = vst [vmem:[#allocation10_spill] sm:$0xff] %v2910_v38  ;;  %v2013_v53 = vadd.f32 %v2832_v0, %v1977_v52  ;;  %v1841_v34 = vrot.slane %v1745_v12, 2  ;;  %v4854_v40 = vrot.slane %v2910_v38, 2  ;;  %v413_v30 = vmul.f32 %v2632_v2, %v291_v43  ;;  %v2939_v12 = vld [vmem:[%s2653_s18 + $0x90] sm:$0xff] }
  0x30   : > { %v1161_v28 = vadd.f32 %v1051_v33, %v919_v39  ;;  %v1601_v51 = vsel %vm497_vm1, %v1599_v58, %v4849_v24  ;;  %5019 = vst [vmem:[#allocation12_spill] sm:$0xff] %v2927_v14  ;;  %v2931_v36 = vmul.f32 %v2632_v2, %v2913_v50  ;;  %v656_v23 = vmul.f32 %v2637_v3, %v291_v43 }
  0x31   : > { %2465 = vmatmul.msk.f32.vlgmr.msra.gmra.mxu3 %vm2026_vm3, %v2013_v53  ;;  %v1843_v52 = vsel %vm740_vm2, %v1841_v34, %v4854_v40  ;;  %5020 = vst [vmem:[#allocation13_spill] sm:$0xff] %v2939_v12  ;;  %v518_v33 = vrot.slane %v413_v30, 1  ;;  %v2943_v58 = vmul.f32 %v2637_v3, %v2913_v50  ;;  %v895_v39 = vmul.f32 %v2643_v4, %v2917_v62 }
  0x32   : > { %v1403_v24 = vadd.f32 %v1293_v37, %v1161_v28  ;;  %v4868_v20 = vrot.slane %v2931_v36, 1  ;;  %v761_v43 = vrot.slane %v656_v23, 2  ;;  %v965_v53 = vmul.f32 %v2648_v5, %v2917_v62 }
  0x33   : > { %v2956_v30 = vmul.f32 %v2648_v5, %v2927_v14  ;;  %v1207_v40 = vmul.f32 %v2658_v6, %v2917_v62  ;;  %v2962_v28 = vmul.f32 %v2658_v6, %v2927_v14  ;;  %v1445_v34 = vmul.f32 %v2680_v15, %v2939_v12 }
  0x34   : > { %v1469_v37 = vadd.f32 %v1437_v11, %v1403_v24  ;;  %v520_v23 = vsel %vm497_vm1, %v518_v33, %v4868_v20  ;;  %v1069_v7 = vrot.slane %v965_v53, 1  ;;  %v5023_v17 = vrot.slane %v2943_v58, 2 }
  0x35   : > { %5022 = vst [vmem:[#allocation15_spill] sm:$0xff] %v2956_v30  ;;  %v618_v48 = vadd.f32 %v520_v23, %v343_v46  ;;  %v4869_v62 = vrot.slane %v2956_v30, 1  ;;  %v1311_v38 = vrot.slane %v1207_v40, 2  ;;  %v4875_v11 = vrot.slane %v2962_v28, 2 }
  0x36   : > { %v763_v9 = vsel %vm740_vm2, %v761_v43, %v5023_v17  ;;  %v1711_v14 = vadd.f32 %v1601_v51, %v1469_v37  ;;  %v1515_v24 = vmul.f32 %v2685_v16, %v2939_v12  ;;  %v2978_v33 = vmul.f32 %v2685_v16, %v2951_v32  ;;  %v305_v51 = vld [vmem:[%s2653_s18 + $0xd0] sm:$0x3] }
  0x37   : > { %v861_v53 = vadd.f32 %v763_v9, %v618_v48  ;;  %v1071_v17 = vsel %vm497_vm1, %v1069_v7, %v4869_v62  ;;  %v1757_v46 = vmul.f32 %v2708_v26, %v2939_v12  ;;  %v2987_v40 = vmul.f32 %v2708_v26, %v2951_v32  ;;  %v2995_v48 = vld [vmem:[%s2653_s18 + $0xe8] sm:$0x3] }
  0x38   : > { %5024 = vst [vmem:[#allocation16_spill] sm:$0xff] %v2978_v33  ;;  %v1953_v43 = vadd.f32 %v1843_v52, %v1711_v14  ;;  %v1313_v37 = vsel %vm740_vm2, %v1311_v38, %v4875_v11  ;;  %v1619_v23 = vrot.slane %v1515_v24, 1  ;;  %v4873_v9 = vrot.slane %v2978_v33, 1  ;;  %v3005_v52 = vld [vmem:[%s2653_s18 + $0x100] sm:$0x3] }
  0x39   : > { %5025 = vst [vmem:[#allocation17_spill] sm:$0xff] %v2987_v40  ;;  %v927_v20 = vadd.f32 %v895_v39, %v861_v53  ;;  %v1861_v7 = vrot.slane %v1757_v46, 2  ;;  %v4874_v62 = vrot.slane %v2987_v40, 2  ;;  %v352_v12 = vmul.f32 %v2627_v1, %v2662_v8  ;;  %v317_v11 = vld [vmem:[%s2653_s18 + $0x130] sm:$0x3] }
  0x3a   : > { %5026 = vst [vmem:[#allocation18_spill] sm:$0xff] %v2995_v48  ;;  %v1989_v30 = vadd.f32 %v2832_v0, %v1953_v43  ;;  %v1621_v14 = vsel %vm497_vm1, %v1619_v23, %v4873_v9  ;;  %v427_v38 = vmul.f32 %v2632_v2, %v305_v51  ;;  %v670_v24 = vmul.f32 %v2637_v3, %v305_v51  ;;  %v3038_v33 = vld [vmem:[%s2653_s18 + $0x148] sm:$0x3] }
  0x3b   : > { %5027 = vst [vmem:[#allocation19_spill] sm:$0xff] %v3005_v52  ;;  %v1169_v39 = vadd.f32 %v1071_v17, %v927_v20  ;;  %v1863_v53 = vsel %vm740_vm2, %v1861_v7, %v4874_v62  ;;  %v904_v8 = vmul.f32 %v2643_v4, %v2668_v10  ;;  %v979_v46 = vmul.f32 %v2648_v5, %v2995_v48 }
  0x3c   : > { %2441 = vmatmul.msk.f32.vlgmr.msra.gmra.mxu0 %vm2026_vm3, %v1989_v30  ;;  %v541_v43 = vrot.slane %v427_v38, 1  ;;  %v784_v23 = vrot.slane %v670_v24, 2  ;;  %v1221_v9 = vmul.f32 %v2658_v6, %v2995_v48  ;;  %v1454_v20 = vmul.f32 %v2680_v15, %v2711_v27 }
  0x3d   : > { %v1411_v17 = vadd.f32 %v1313_v37, %v1169_v39  ;;  %v1092_v51 = vrot.slane %v979_v46, 1  ;;  %v1529_v7 = vmul.f32 %v2685_v16, %v3005_v52  ;;  %v1771_v62 = vmul.f32 %v2708_v26, %v3005_v52 }
  0x3e   : > { %v5028_v30 = vrot.slane %v2674_v13, 1  ;;  %v5029_v24 = vrot.slane %v2692_v18, 2  ;;  %v1334_v40 = vrot.slane %v1221_v9, 2  ;;  %v360_v37 = vmul.f32 %v2627_v1, %v2735_v41 }
  0x3f   : > { %v1477_v39 = vadd.f32 %v1445_v34, %v1411_v17  ;;  %v5030_v27 = vrot.slane %v2700_v21, 1  ;;  %v1642_v10 = vrot.slane %v1529_v7, 1  ;;  %v5031_v13 = vrot.slane %v2717_v31, 2 }
  0x40   : > { %v542_v38 = vsel %vm497_vm1, %v5028_v30, %v541_v43  ;;  %v785_v48 = vsel %vm740_vm2, %v5029_v24, %v784_v23  ;;  %v1884_v43 = vrot.slane %v1771_v62, 2  ;;  %v439_v23 = vmul.f32 %v2632_v2, %v317_v11 }
  0x41   : > { %v627_v46 = vadd.f32 %v542_v38, %v352_v12  ;;  %v1093_v52 = vsel %vm497_vm1, %v5030_v27, %v1092_v51  ;;  %v1335_v18 = vsel %vm740_vm2, %v5031_v13, %v1334_v40  ;;  %v682_v9 = vmul.f32 %v2637_v3, %v317_v11  ;;  %v3049_v27 = vld [vmem:[%s2653_s18 + $0x160] sm:$0x3] }
  0x42   : > { %v1719_v30 = vadd.f32 %v1621_v14, %v1477_v39  ;;  %v5032_v12 = vrot.slane %v2739_v42, 1  ;;  %v912_v34 = vmul.f32 %v2643_v4, %v2762_v56  ;;  %v5033_v31 = vrot.slane %v2745_v45, 2  ;;  %v281_v39 = vld [vmem:[%s2653_s18 + $0x10] sm:$0x3] }
  0x43   : > { %v870_v41 = vadd.f32 %v785_v48, %v627_v46  ;;  %v561_v40 = vrot.slane %v439_v23, 1  ;;  %v804_v17 = vrot.slane %v682_v9, 2  ;;  %v991_v11 = vmul.f32 %v2648_v5, %v3038_v33 }
  0x44   : > { %v1643_v21 = vsel %vm497_vm1, %v5032_v12, %v1642_v10  ;;  %v1885_v62 = vsel %vm740_vm2, %v5033_v31, %v1884_v43  ;;  %v1961_v48 = vadd.f32 %v1863_v53, %v1719_v30  ;;  %v1233_v10 = vmul.f32 %v2658_v6, %v3038_v33  ;;  %v3078_v30 = vld [vmem:[%s2653_s18 + $0x28] sm:$0x3] }
  0x45   : > { %v936_v42 = vadd.f32 %v904_v8, %v870_v41  ;;  %v1462_v14 = vmul.f32 %v2680_v15, %v2785_v19  ;;  %v5034_v51 = vrot.slane %v2759_v54, 1  ;;  %v5035_v7 = vrot.slane %v2767_v59, 2 }
  0x46   : > { %v1112_v24 = vrot.slane %v991_v11, 1  ;;  %v1541_v53 = vmul.f32 %v2685_v16, %v3049_v27  ;;  %v1997_v8 = vadd.f32 %v2832_v0, %v1961_v48  ;;  %v1354_v43 = vrot.slane %v1233_v10, 2 }
  0x47   : > { %v562_v45 = vsel %vm497_vm1, %v5034_v51, %v561_v40  ;;  %v805_v38 = vsel %vm740_vm2, %v5035_v7, %v804_v17  ;;  %v1178_v46 = vadd.f32 %v1093_v52, %v936_v42  ;;  %v5036_v23 = vrot.slane %v2792_v22, 1 }
  0x48   : > { %v635_v13 = vadd.f32 %v562_v45, %v360_v37  ;;  %v1662_v9 = vrot.slane %v1541_v53, 1  ;;  %v1783_v59 = vmul.f32 %v2708_v26, %v3049_v27  ;;  %v336_v41 = vmul.f32 %v2627_v1, %v2827_v57  ;;  %2449 = vmatmul.msk.f32.vlgmr.msra.gmra.mxu1 %vm2026_vm3, %v1997_v8 }
  0x49   : > { %v1113_v54 = vsel %vm497_vm1, %v5036_v23, %v1112_v24  ;;  %v1420_v12 = vadd.f32 %v1335_v18, %v1178_v46  ;;  %v5037_v37 = vrot.slane %v2798_v25, 2  ;;  %v403_v31 = vmul.f32 %v2632_v2, %v281_v39  ;;  %v3094_v18 = vld [vmem:[%s2653_s18 + $0x40] sm:$0x3] }
  0x4a   : > { %v878_v52 = vadd.f32 %v805_v38, %v635_v13  ;;  %v5038_v40 = vrot.slane %v2811_v47, 1  ;;  %v1904_v11 = vrot.slane %v1783_v59, 2  ;;  %v646_v48 = vmul.f32 %v2637_v3, %v281_v39 }
  0x4b   : > { %v1355_v22 = vsel %vm740_vm2, %v5037_v37, %v1354_v43  ;;  %v888_v57 = vmul.f32 %v2643_v4, %v2845_v63  ;;  %v1486_v42 = vadd.f32 %v1454_v20, %v1420_v12  ;;  %v501_v25 = vrot.slane %v403_v31, 1  ;;  %v3123_v31 = vld [vmem:[%s2653_s18 + $0x88] sm:$0x3] }
  0x4c   : > { %v1663_v17 = vsel %vm497_vm1, %v5038_v40, %v1662_v9  ;;  %v944_v10 = vadd.f32 %v912_v34, %v878_v52  ;;  %v955_v51 = vmul.f32 %v2648_v5, %v3078_v30  ;;  %v5039_v45 = vrot.slane %v2824_v55, 2  ;;  %v293_v9 = vld [vmem:[%s2653_s18 + $0x70] sm:$0x3] }
  0x4d   : > { %v744_v7 = vrot.slane %v646_v48, 2  ;;  %v1197_v38 = vmul.f32 %v2658_v6, %v3078_v30  ;;  %v1438_v24 = vmul.f32 %v2680_v15, %v2875_v60  ;;  %v1728_v20 = vadd.f32 %v1643_v21, %v1486_v42 }
  0x4e   : > { %v1905_v47 = vsel %vm740_vm2, %v5039_v45, %v1904_v11  ;;  %v1186_v34 = vadd.f32 %v1113_v54, %v944_v10  ;;  %v5040_v53 = vrot.slane %v2849_v44, 1  ;;  %v1052_v8 = vrot.slane %v955_v51, 1  ;;  %v5046_v51 = vld [vmem:[#allocation12_spill] sm:$0xff] }
  0x4f   : > { %v5041_v55 = vrot.slane %v2857_v61, 2  ;;  %v1294_v43 = vrot.slane %v1197_v38, 2  ;;  %v1505_v23 = vmul.f32 %v2685_v16, %v3094_v18  ;;  %v1970_v59 = vadd.f32 %v1885_v62, %v1728_v20 }
  0x50   : > { %v502_v39 = vsel %vm497_vm1, %v5040_v53, %v501_v25  ;;  %v1428_v21 = vadd.f32 %v1355_v22, %v1186_v34  ;;  %v5042_v54 = vrot.slane %v2871_v35, 1  ;;  %v1747_v12 = vmul.f32 %v2708_v26, %v3094_v18 }
  0x51   : > { %v611_v46 = vadd.f32 %v502_v39, %v336_v41  ;;  %v745_v13 = vsel %vm740_vm2, %v5041_v55, %v744_v7  ;;  %v5043_v61 = vrot.slane %v2884_v29, 2  ;;  %v1602_v37 = vrot.slane %v1505_v23, 1  ;;  %v3133_v29 = vld [vmem:[%s2653_s18 + $0xa0] sm:$0x3] }
  0x52   : > { %v1053_v44 = vsel %vm497_vm1, %v5042_v54, %v1052_v8  ;;  %v344_v40 = vmul.f32 %v2627_v1, %v2913_v50  ;;  %v2006_v62 = vadd.f32 %v2832_v0, %v1970_v59  ;;  %v1494_v22 = vadd.f32 %v1462_v14, %v1428_v21  ;;  %5045 = vst [vmem:[#allocation20_spill] sm:$0xff] %v3133_v29  ;;  %v5047_v7 = vld [vmem:[#allocation10_spill] sm:$0xff] }
  0x53   : > { %v854_v41 = vadd.f32 %v745_v13, %v611_v46  ;;  %v1295_v52 = vsel %vm740_vm2, %v5043_v61, %v1294_v43  ;;  %v1844_v35 = vrot.slane %v1747_v12, 2  ;;  %v415_v11 = vmul.f32 %v2632_v2, %v293_v9 }
  0x54   : > { %v5044_v42 = vrot.slane %v2900_v49, 1  ;;  %v658_v25 = vmul.f32 %v2637_v3, %v293_v9  ;;  %v896_v45 = vmul.f32 %v2643_v4, %v5046_v51  ;;  %2458 = vmatmul.msk.f32.gmra.mxu2 %vm2026_vm3, %v2006_v62  ;;  %v1736_v50 = vadd.f32 %v1663_v17, %v1494_v22  ;;  %v5055_v22 = vld [vmem:[#allocation16_spill] sm:$0xff] }
  0x55   : > { %v920_v48 = vadd.f32 %v888_v57, %v854_v41  ;;  %v5048_v14 = vrot.slane %v5047_v7, 2  ;;  %v521_v20 = vrot.slane %v415_v11, 1  ;;  %v967_v49 = vmul.f32 %v2648_v5, %v3123_v31 }
  0x56   : > { %v1603_v10 = vsel %vm497_vm1, %v5044_v42, %v1602_v37  ;;  %v764_v34 = vrot.slane %v658_v25, 2  ;;  %v1209_v53 = vmul.f32 %v2658_v6, %v3123_v31  ;;  %v1446_v39 = vmul.f32 %v2680_v15, %v2951_v32 }
  0x57   : > { %v1845_v38 = vsel %vm740_vm2, %v5048_v14, %v1844_v35  ;;  %v1162_v57 = vadd.f32 %v1053_v44, %v920_v48  ;;  %v1978_v8 = vadd.f32 %v1905_v47, %v1736_v50  ;;  %v5049_v46 = vrot.slane %v2931_v36, 1  ;;  %v5051_v44 = vld [vmem:[#allocation15_spill] sm:$0xff] }
  0x58   : > { %v1072_v55 = vrot.slane %v967_v49, 1  ;;  %v1517_v13 = vmul.f32 %v2685_v16, %v3133_v29  ;;  %v5050_v9 = vrot.slane %v2943_v58, 2  ;;  %v1314_v21 = vrot.slane %v1209_v53, 2  ;;  %v5054_v58 = vld [vmem:[#allocation2_spill] sm:$0xff] }
  0x59   : > { %v522_v17 = vsel %vm497_vm1, %v5049_v46, %v521_v20  ;;  %v1404_v43 = vadd.f32 %v1295_v52, %v1162_v57  ;;  %v2014_v54 = vadd.f32 %v2832_v0, %v1978_v8  ;;  %v5052_v12 = vrot.slane %v5051_v44, 1  ;;  %v5058_v20 = vld [vmem:[#allocation17_spill] sm:$0xff]  ;;  %v5060_v8 = vld [vmem:[#allocation4_spill] sm:$0xff] }
  0x5a   : > { %v619_v23 = vadd.f32 %v522_v17, %v344_v40  ;;  %v765_v59 = vsel %vm740_vm2, %v5050_v9, %v764_v34  ;;  %v1622_v36 = vrot.slane %v1517_v13, 1  ;;  %v1759_v41 = vmul.f32 %v2708_v26, %v3133_v29  ;;  %v3191_v13 = vld [vmem:[%s2653_s18 + $0x108] sm:$0xff]  ;;  %v5062_v9 = vld [vmem:[#allocation5_spill] sm:$0xff]  ;;  %v3206_v44 = vld [vmem:[%s2653_s18 + $0x110] sm:$0xff] }
  0x5b   : > { %v1073_v47 = vsel %vm497_vm1, %v5052_v12, %v1072_v55  ;;  %v1470_v61 = vadd.f32 %v1438_v24, %v1404_v43  ;;  %v5053_v52 = vrot.slane %v2962_v28, 2  ;;  %v353_v62 = vmul.f32 %v2627_v1, %v5054_v58  ;;  %2466 = vmatmul.msk.f32.gmra.mxu3 %vm2026_vm3, %v2014_v54  ;;  %v5057_v24 = vld [vmem:[#allocation3_spill] sm:$0xff]  ;;  %5061 = vst [vmem:[#allocation12_spill] sm:$0xff] %v3191_v13 }
  0x5c   : > { %v862_v37 = vadd.f32 %v765_v59, %v619_v23  ;;  %v5056_v35 = vrot.slane %v5055_v22, 1  ;;  %v1864_v48 = vrot.slane %v1759_v41, 2  ;;  %v428_v42 = vmul.f32 %v2632_v2, %v5054_v58  ;;  %5063 = vst [vmem:[#allocation10_spill] sm:$0xff] %v3206_v44 }
  0x5d   : > { %v1315_v40 = vsel %vm740_vm2, %v5053_v52, %v1314_v21  ;;  %v3175_v25 = vmul.f32 %v2632_v2, %v5057_v24  ;;  %v1712_v28 = vadd.f32 %v1603_v10, %v1470_v61  ;;  %v671_v7 = vmul.f32 %v2637_v3, %v5054_v58 }
  0x5e   : > { %v1623_v11 = vsel %vm497_vm1, %v5056_v35, %v1622_v36  ;;  %v928_v50 = vadd.f32 %v896_v45, %v862_v37  ;;  %v3181_v14 = vmul.f32 %v2637_v3, %v5057_v24  ;;  %v5059_v49 = vrot.slane %v5058_v20, 2 }
  0x5f   : > { %v543_v34 = vrot.slane %v428_v42, 1  ;;  %v4897_v53 = vrot.slane %v3175_v25, 1  ;;  %v905_v46 = vmul.f32 %v2643_v4, %v5060_v8  ;;  %v1954_v10 = vadd.f32 %v1845_v38, %v1712_v28 }
  0x60   : > { %v1865_v57 = vsel %vm740_vm2, %v5059_v49, %v1864_v48  ;;  %v1170_v45 = vadd.f32 %v1073_v47, %v928_v50  ;;  %v786_v17 = vrot.slane %v671_v7, 2  ;;  %v4895_v55 = vrot.slane %v3181_v14, 2 }
  0x61   : > { %v545_v43 = vsel %vm497_vm1, %v543_v34, %v4897_v53  ;;  %v980_v23 = vmul.f32 %v2648_v5, %v5060_v8  ;;  %v3200_v59 = vmul.f32 %v2648_v5, %v5062_v9  ;;  %v1222_v38 = vmul.f32 %v2658_v6, %v5060_v8  ;;  %v5064_v8 = vld [vmem:[#allocation6_spill] sm:$0xff] }
  0x62   : > { %v1990_v21 = vadd.f32 %v2832_v0, %v1954_v10  ;;  %v1412_v54 = vadd.f32 %v1315_v40, %v1170_v45  ;;  %v628_v12 = vadd.f32 %v545_v43, %v353_v62  ;;  %v788_v47 = vsel %vm740_vm2, %v786_v17, %v4895_v55  ;;  %v3350_v55 = vld [vmem:[%s2653_s18 + $0x50] sm:$0xff] }
  0x63   : > { %v1094_v36 = vrot.slane %v980_v23, 1  ;;  %v4894_v41 = vrot.slane %v3200_v59, 1  ;;  %v3214_v61 = vmul.f32 %v2658_v6, %v5062_v9  ;;  %v1336_v37 = vrot.slane %v1222_v38, 2 }
  0x64   : > { %2442 = vmatmul.msk.f32.gmra.mxu0 %vm2026_vm3, %v1990_v21  ;;  %v1478_v52 = vadd.f32 %v1446_v39, %v1412_v54  ;;  %v871_v58 = vadd.f32 %v788_v47, %v628_v12  ;;  %v1455_v40 = vmul.f32 %v2680_v15, %v3191_v13  ;;  %v1530_v62 = vmul.f32 %v2685_v16, %v3191_v13  ;;  %v3262_v47 = vld [vmem:[%s2653_s18 + $0x168] sm:$0xff] }
  0x65   : > { %v1096_v22 = vsel %vm497_vm1, %v1094_v36, %v4894_v41  ;;  %v4893_v35 = vrot.slane %v3214_v61, 2  ;;  %v3227_v48 = vmul.f32 %v2685_v16, %v3206_v44  ;;  %v1772_v39 = vmul.f32 %v2708_v26, %v3191_v13  ;;  %5065 = vst [vmem:[#allocation15_spill] sm:$0xff] %v3262_v47 }
  0x66   : > { %v1720_v42 = vadd.f32 %v1623_v11, %v1478_v52  ;;  %v937_v28 = vadd.f32 %v905_v46, %v871_v58  ;;  %v1644_v50 = vrot.slane %v1530_v62, 1  ;;  %v3233_v7 = vmul.f32 %v2708_v26, %v3206_v44  ;;  %v5066_v62 = vld [vmem:[#allocation7_spill] sm:$0xff] }
  0x67   : > { %v1338_v20 = vsel %vm740_vm2, %v1336_v37, %v4893_v35  ;;  %v4892_v49 = vrot.slane %v3227_v48, 1  ;;  %v1886_v34 = vrot.slane %v1772_v39, 2  ;;  %v361_v10 = vmul.f32 %v2627_v1, %v5064_v8 }
  0x68   : > { %v1962_v45 = vadd.f32 %v1865_v57, %v1720_v42  ;;  %v1179_v17 = vadd.f32 %v1096_v22, %v937_v28  ;;  %v4891_v11 = vrot.slane %v3233_v7, 2  ;;  %v440_v46 = vmul.f32 %v2632_v2, %v5064_v8  ;;  %v3270_v42 = vld [vmem:[%s2653_s18 + $0x170] sm:$0xff] }
  0x69   : > { %v1646_v43 = vsel %vm497_vm1, %v1644_v50, %v4892_v49  ;;  %v3249_v23 = vmul.f32 %v2632_v2, %v2762_v56  ;;  %v683_v38 = vmul.f32 %v2637_v3, %v5064_v8  ;;  %v3255_v57 = vmul.f32 %v2637_v3, %v2762_v56 }
  0x6a   : > { %v1998_v21 = vadd.f32 %v2832_v0, %v1962_v45  ;;  %v1421_v54 = vadd.f32 %v1338_v20, %v1179_v17  ;;  %v1888_v12 = vsel %vm740_vm2, %v1886_v34, %v4891_v11  ;;  %v563_v36 = vrot.slane %v440_v46, 1 }
  0x6b   : > { %v4887_v37 = vrot.slane %v3249_v23, 1  ;;  %v806_v52 = vrot.slane %v683_v38, 2  ;;  %v4886_v58 = vrot.slane %v3255_v57, 2  ;;  %v913_v22 = vmul.f32 %v2643_v4, %v5066_v62 }
  0x6c   : > { %2450 = vmatmul.msk.f32.gmra.mxu1 %vm2026_vm3, %v1998_v21  ;;  %v1487_v39 = vadd.f32 %v1455_v40, %v1421_v54  ;;  %v992_v28 = vmul.f32 %v2648_v5, %v5066_v62  ;;  %v3276_v50 = vmul.f32 %v2648_v5, %v2785_v19  ;;  %v1234_v20 = vmul.f32 %v2658_v6, %v5066_v62 }
  0x6d   : > { %v565_v34 = vsel %vm497_vm1, %v563_v36, %v4887_v37  ;;  %v808_v40 = vsel %vm740_vm2, %v806_v52, %v4886_v58  ;;  %v3288_v8 = vmul.f32 %v2658_v6, %v2785_v19  ;;  %v1463_v45 = vmul.f32 %v2680_v15, %v3262_v47 }
  0x6e   : > { %v1729_v17 = vadd.f32 %v1646_v43, %v1487_v39  ;;  %v636_v46 = vadd.f32 %v565_v34, %v361_v10  ;;  %v1114_v38 = vrot.slane %v992_v28, 1  ;;  %v4888_v21 = vrot.slane %v3276_v50, 1 }
  0x6f   : > { %v1356_v54 = vrot.slane %v1234_v20, 2  ;;  %v4889_v62 = vrot.slane %v3288_v8, 2  ;;  %v1542_v36 = vmul.f32 %v2685_v16, %v3262_v47  ;;  %v3298_v52 = vmul.f32 %v2685_v16, %v3270_v42 }
  0x70   : > { %v1971_v58 = vadd.f32 %v1888_v12, %v1729_v17  ;;  %v879_v37 = vadd.f32 %v808_v40, %v636_v46  ;;  %v1116_v43 = vsel %vm497_vm1, %v1114_v38, %v4888_v21  ;;  %v1784_v10 = vmul.f32 %v2708_v26, %v3262_v47  ;;  %v5067_v46 = vld [vmem:[#allocation8_spill] sm:$0xff] }
  0x71   : > { %v1358_v39 = vsel %vm740_vm2, %v1356_v54, %v4889_v62  ;;  %v1664_v28 = vrot.slane %v1542_v36, 1  ;;  %v4890_v20 = vrot.slane %v3298_v52, 1  ;;  %v3311_v34 = vmul.f32 %v2708_v26, %v3270_v42 }
  0x72   : > { %v2007_v12 = vadd.f32 %v2832_v0, %v1971_v58  ;;  %v945_v40 = vadd.f32 %v913_v22, %v879_v37  ;;  %v1906_v17 = vrot.slane %v1784_v10, 2  ;;  %v337_v38 = vmul.f32 %v2627_v1, %v5067_v46  ;;  %v5068_v10 = vld [vmem:[#allocation9_spill] sm:$0xff] }
  0x73   : > { %v1666_v21 = vsel %vm497_vm1, %v1664_v28, %v4890_v20  ;;  %v4896_v54 = vrot.slane %v3311_v34, 2  ;;  %v404_v36 = vmul.f32 %v2632_v2, %v5067_v46  ;;  %v3324_v62 = vmul.f32 %v2632_v2, %v2845_v63 }
  0x74   : > { %2459 = vmatmul.msk.f32.gmra.mxu2 %vm2026_vm3, %v2007_v12  ;;  %v1187_v37 = vadd.f32 %v1116_v43, %v945_v40  ;;  %v647_v58 = vmul.f32 %v2637_v3, %v5067_v46  ;;  %v3331_v22 = vmul.f32 %v2637_v3, %v2845_v63  ;;  %v889_v28 = vmul.f32 %v2643_v4, %v5068_v10  ;;  %v3342_v40 = vld [vmem:[%s2653_s18 + $0x48] sm:$0xff] }
  0x75   : > { %v1908_v20 = vsel %vm740_vm2, %v1906_v17, %v4896_v54  ;;  %v503_v11 = vrot.slane %v404_v36, 1  ;;  %v4904_v49 = vrot.slane %v3324_v62, 1  ;;  %v956_v43 = vmul.f32 %v2648_v5, %v5068_v10  ;;  %5069 = vst [vmem:[#allocation2_spill] sm:$0xff] %v3342_v40 }
  0x76   : > { %v1429_v12 = vadd.f32 %v1358_v39, %v1187_v37  ;;  %v746_v46 = vrot.slane %v647_v58, 2  ;;  %v4906_v35 = vrot.slane %v3331_v22, 2  ;;  %v3347_v41 = vmul.f32 %v2648_v5, %v2875_v60 }
  0x77   : > { %v505_v17 = vsel %vm497_vm1, %v503_v11, %v4904_v49  ;;  %v1054_v36 = vrot.slane %v956_v43, 1  ;;  %v1198_v54 = vmul.f32 %v2658_v6, %v5068_v10  ;;  %v3359_v39 = vmul.f32 %v2658_v6, %v2875_v60 }
  0x78   : > { %v1495_v37 = vadd.f32 %v1463_v45, %v1429_v12  ;;  %v612_v58 = vadd.f32 %v505_v17, %v337_v38  ;;  %v748_v53 = vsel %vm740_vm2, %v746_v46, %v4906_v35  ;;  %v4905_v47 = vrot.slane %v3347_v41, 1 }
  0x79   : > { %v1296_v13 = vrot.slane %v1198_v54, 2  ;;  %v4907_v29 = vrot.slane %v3359_v39, 2  ;;  %v1439_v11 = vmul.f32 %v2680_v15, %v3342_v40  ;;  %v1506_v10 = vmul.f32 %v2685_v16, %v3342_v40 }
  0x7a   : > { %v1737_v43 = vadd.f32 %v1666_v21, %v1495_v37  ;;  %v855_v49 = vadd.f32 %v748_v53, %v612_v58  ;;  %v1056_v45 = vsel %vm497_vm1, %v1054_v36, %v4905_v47  ;;  %v3375_v38 = vmul.f32 %v2685_v16, %v3350_v55  ;;  %v5072_v37 = vld [vmem:[#allocation11_spill] sm:$0xff] }
  0x7b   : > { %v1298_v54 = vsel %vm740_vm2, %v1296_v13, %v4907_v29  ;;  %v1604_v12 = vrot.slane %v1506_v10, 1  ;;  %v1748_v46 = vmul.f32 %v2708_v26, %v3342_v40  ;;  %v3384_v21 = vmul.f32 %v2708_v26, %v3350_v55 }
  0x7c   : > { %5070 = vst [vmem:[#allocation16_spill] sm:$0xff] %v3375_v38  ;;  %v1979_v53 = vadd.f32 %v1908_v20, %v1737_v43  ;;  %v921_v17 = vadd.f32 %v889_v28, %v855_v49  ;;  %v4908_v36 = vrot.slane %v3375_v38, 1  ;;  %v345_v58 = vmul.f32 %v2627_v1, %v5072_v37 }
  0x7d   : > { %5071 = vst [vmem:[#allocation3_spill] sm:$0xff] %v3384_v21  ;;  %v1846_v47 = vrot.slane %v1748_v46, 2  ;;  %v4909_v35 = vrot.slane %v3384_v21, 2  ;;  %v416_v13 = vmul.f32 %v2632_v2, %v5072_v37  ;;  %v3394_v10 = vmul.f32 %v2632_v2, %v5046_v51 }
  0x7e   : > { %v2015_v29 = vadd.f32 %v2832_v0, %v1979_v53  ;;  %v1163_v20 = vadd.f32 %v1056_v45, %v921_v17  ;;  %v1606_v49 = vsel %vm497_vm1, %v1604_v12, %v4908_v36  ;;  %v659_v1 = vmul.f32 %v2637_v3, %v5072_v37  ;;  %v3412_v53 = vld [vmem:[%s2653_s18 + $0xa8] sm:$0xff]  ;;  %v5076_v17 = vld [vmem:[#allocation13_spill] sm:$0xff] }
  0x7f   : > { %5073 = vst [vmem:[#allocation17_spill] sm:$0xff] %v3394_v10  ;;  %v1848_v28 = vsel %vm740_vm2, %v1846_v47, %v4909_v35  ;;  %v523_v43 = vrot.slane %v416_v13, 1  ;;  %v4910_v46 = vrot.slane %v3394_v10, 1  ;;  %v3408_v2 = vmul.f32 %v2637_v3, %v5046_v51 }
  0x80   : > { %2467 = vmatmul.msk.f32.gmra.mxu3 %vm2026_vm3, %v2015_v29  ;;  %v1405_v45 = vadd.f32 %v1298_v54, %v1163_v20  ;;  %5075 = vst [vmem:[#allocation5_spill] sm:$0xff] %v3412_v53  ;;  %v766_v12 = vrot.slane %v659_v1, 2  ;;  %v897_v37 = vmul.f32 %v2643_v4, %v5076_v17  ;;  %v968_v36 = vmul.f32 %v2648_v5, %v5076_v17  ;;  %v3429_v20 = vld [vmem:[%s2653_s18 + $0xb0] sm:$0xff] }
  0x81   : > { %5074 = vst [vmem:[#allocation4_spill] sm:$0xff] %v3408_v2  ;;  %v525_v47 = vsel %vm497_vm1, %v523_v43, %v4910_v46  ;;  %v4915_v13 = vrot.slane %v3408_v2, 2  ;;  %v3424_v3 = vmul.f32 %v2648_v5, %v2951_v32  ;;  %v1210_v29 = vmul.f32 %v2658_v6, %v5076_v17 }
  0x82   : > { %v1471_v54 = vadd.f32 %v1439_v11, %v1405_v45  ;;  %5078 = vst [vmem:[#allocation7_spill] sm:$0xff] %v3429_v20  ;;  %v620_v4 = vadd.f32 %v525_v47, %v345_v58  ;;  %v1074_v1 = vrot.slane %v968_v36, 1  ;;  %v3433_v35 = vmul.f32 %v2658_v6, %v2951_v32 }
  0x83   : > { %5077 = vst [vmem:[#allocation6_spill] sm:$0xff] %v3424_v3  ;;  %v768_v43 = vsel %vm740_vm2, %v766_v12, %v4915_v13  ;;  %v4913_v46 = vrot.slane %v3424_v3, 1  ;;  %v1316_v5 = vrot.slane %v1210_v29, 2  ;;  %v1447_v40 = vmul.f32 %v2680_v15, %v3412_v53  ;;  %v5083_v13 = vld [vmem:[#allocation19_spill] sm:$0xff] }
  0x84   : > { %5079 = vst [vmem:[#allocation8_spill] sm:$0xff] %v3433_v35  ;;  %v1713_v17 = vadd.f32 %v1606_v49, %v1471_v54  ;;  %v863_v11 = vadd.f32 %v768_v43, %v620_v4  ;;  %v4914_v45 = vrot.slane %v3433_v35, 2  ;;  %v1518_v36 = vmul.f32 %v2685_v16, %v3412_v53  ;;  %v3465_v43 = vld [vmem:[%s4826_s1] ss:$0 sm:$0xff] }
  0x85   : > { %v1076_v6 = vsel %vm497_vm1, %v1074_v1, %v4913_v46  ;;  %v3449_v58 = vmul.f32 %v2685_v16, %v3429_v20  ;;  %v1760_v12 = vmul.f32 %v2708_v26, %v3412_v53  ;;  %v3455_v15 = vmul.f32 %v2708_v26, %v3429_v20  ;;  %v3511_v53 = vld [vmem:[%s4826_s1 + $0x5] ss:$0 sm:$0xff] }
  0x86   : > { %v1955_v49 = vadd.f32 %v1848_v28, %v1713_v17  ;;  %v929_v47 = vadd.f32 %v897_v37, %v863_v11  ;;  %v1318_v29 = vsel %vm740_vm2, %v1316_v5, %v4914_v45  ;;  %v1624_v54 = vrot.slane %v1518_v36, 1  ;;  %v3471_v17 = vld [vmem:[%s2653_s18 + $0x118] sm:$0x3]  ;;  %v3476_v5 = vld [vmem:[%s4826_s1 + $0x1] ss:$0 sm:$0xff] }
  0x87   : > { %5080 = vst [vmem:[#allocation9_spill] sm:$0xff] %v3449_v58  ;;  %v4916_v4 = vrot.slane %v3449_v58, 1  ;;  %v1866_v1 = vrot.slane %v1760_v12, 2  ;;  %v4917_v16 = vrot.slane %v3455_v15, 2  ;;  %v354_v46 = vmul.f32 %v3465_v43, %v5057_v24  ;;  %v5082_v11 = vld [vmem:[#allocation18_spill] sm:$0xff] }
  0x88   : > { %5081 = vst [vmem:[#allocation11_spill] sm:$0xff] %v3455_v15  ;;  %v1991_v28 = vadd.f32 %v2832_v0, %v1955_v49  ;;  %v1171_v37 = vadd.f32 %v1076_v6, %v929_v47  ;;  %v430_v36 = vmul.f32 %v3476_v5, %v5082_v11  ;;  %v3483_v12 = vld [vmem:[%s4826_s1 + $0x2] ss:$0 sm:$0xff]  ;;  %v3496_v47 = vld [vmem:[%s4826_s1 + $0x3] ss:$0 sm:$0xff]  ;;  %v5085_v35 = vrot.slane %v3181_v14, 2 }
  0x89   : > { %v673_v24 = vmul.f32 %v3483_v12, %v5082_v11  ;;  %v1626_v6 = vsel %vm497_vm1, %v1624_v54, %v4916_v4  ;;  %v1868_v49 = vsel %vm740_vm2, %v1866_v1, %v4917_v16  ;;  %v906_v45 = vmul.f32 %v3496_v47, %v5062_v9  ;;  %v3503_v11 = vld [vmem:[%s4826_s1 + $0x4] ss:$0 sm:$0xff]  ;;  %v3518_v58 = vld [vmem:[%s4826_s1 + $0x6] ss:$0 sm:$0xff] }
  0x8a   : > { %v982_v54 = vmul.f32 %v3503_v11, %v5083_v13  ;;  %2443 = vmatmul.msk.f32.gmra.mxu0 %vm2026_vm3, %v1991_v28  ;;  %v1413_v4 = vadd.f32 %v1318_v29, %v1171_v37  ;;  %v546_v1 = vrot.slane %v430_v36, 1  ;;  %v1224_v9 = vmul.f32 %v3511_v53, %v5083_v13  ;;  %v3525_v29 = vld [vmem:[%s4826_s1 + $0x7] ss:$0 sm:$0xff] }
  0x8b   : > { %v789_v16 = vrot.slane %v673_v24, 2  ;;  %v1456_v28 = vmul.f32 %v3518_v58, %v3206_v44  ;;  %v1532_v37 = vmul.f32 %v3525_v29, %v3471_v17  ;;  %v1774_v13 = vmul.f32 %v2708_v26, %v3471_v17 }
  0x8c   : > { %v1097_v15 = vrot.slane %v982_v54, 1  ;;  %v1479_v36 = vadd.f32 %v1447_v40, %v1413_v4  ;;  %v5084_v24 = vrot.slane %v3175_v25, 1  ;;  %v1339_v3 = vrot.slane %v1224_v9, 2  ;;  %v3554_v4 = vld [vmem:[%s2653_s18 + $0x178] sm:$0x3] }
  0x8d   : > { %v790_v44 = vsel %vm740_vm2, %v5085_v35, %v789_v16  ;;  %v5086_v10 = vrot.slane %v3200_v59, 1  ;;  %v1647_v21 = vrot.slane %v1532_v37, 1  ;;  %v1889_v32 = vrot.slane %v1774_v13, 2 }
  0x8e   : > { %v547_v54 = vsel %vm497_vm1, %v5084_v24, %v546_v1  ;;  %v1721_v38 = vadd.f32 %v1626_v6, %v1479_v36  ;;  %v5087_v26 = vrot.slane %v3214_v61, 2  ;;  %v362_v25 = vmul.f32 %v3465_v43, %v2762_v56  ;;  %v3582_v36 = vld [vmem:[%s4826_s1 + $0x8] ss:$0 sm:$0xff] }
  0x8f   : > { %v629_v2 = vadd.f32 %v547_v54, %v354_v46  ;;  %v1098_v20 = vsel %vm497_vm1, %v5086_v10, %v1097_v15  ;;  %v442_v14 = vmul.f32 %v3476_v5, %v3038_v33  ;;  %v5088_v46 = vrot.slane %v3227_v48, 1 }
  0x90   : > { %v1340_v40 = vsel %vm740_vm2, %v5087_v26, %v1339_v3  ;;  %v5089_v10 = vrot.slane %v3233_v7, 2  ;;  %v685_v61 = vmul.f32 %v3483_v12, %v3038_v33  ;;  %v1963_v3 = vadd.f32 %v1868_v49, %v1721_v38 }
  0x91   : > { %v872_v35 = vadd.f32 %v790_v44, %v629_v2  ;;  %v1648_v59 = vsel %vm497_vm1, %v5088_v46, %v1647_v21  ;;  %v566_v16 = vrot.slane %v442_v14, 1  ;;  %v914_v56 = vmul.f32 %v3496_v47, %v2785_v19 }
  0x92   : > { %v1890_v15 = vsel %vm740_vm2, %v5089_v10, %v1889_v32  ;;  %v994_v44 = vmul.f32 %v3503_v11, %v3049_v27  ;;  %v809_v2 = vrot.slane %v685_v61, 2  ;;  %v1236_v7 = vmul.f32 %v3511_v53, %v3049_v27 }
  0x93   : > { %v938_v48 = vadd.f32 %v906_v45, %v872_v35  ;;  %v1464_v32 = vmul.f32 %v3518_v58, %v3270_v42  ;;  %v1999_v21 = vadd.f32 %v2832_v0, %v1963_v3  ;;  %v5090_v33 = vrot.slane %v3249_v23, 1  ;;  %v3601_v3 = vld [vmem:[%s2653_s18 + $0x58] sm:$0x3] }
  0x94   : > { %v1117_v6 = vrot.slane %v994_v44, 1  ;;  %v1544_v19 = vmul.f32 %v3525_v29, %v3554_v4  ;;  %v5091_v45 = vrot.slane %v3255_v57, 2  ;;  %v1359_v27 = vrot.slane %v1236_v7, 2 }
  0x95   : > { %v567_v38 = vsel %vm497_vm1, %v5090_v33, %v566_v16  ;;  %v1180_v49 = vadd.f32 %v1098_v20, %v938_v48  ;;  %2451 = vmatmul.msk.f32.gmra.mxu1 %vm2026_vm3, %v1999_v21  ;;  %v5092_v37 = vrot.slane %v3276_v50, 1  ;;  %v1786_v20 = vmul.f32 %v3582_v36, %v3554_v4 }
  0x96   : > { %v637_v1 = vadd.f32 %v567_v38, %v362_v25  ;;  %v810_v9 = vsel %vm740_vm2, %v5091_v45, %v809_v2  ;;  %v1667_v13 = vrot.slane %v1544_v19, 1  ;;  %v338_v57 = vmul.f32 %v3465_v43, %v2845_v63 }
  0x97   : > { %v1118_v23 = vsel %vm497_vm1, %v5092_v37, %v1117_v6  ;;  %v1422_v24 = vadd.f32 %v1340_v40, %v1180_v49  ;;  %v5093_v26 = vrot.slane %v3288_v8, 2  ;;  %v406_v25 = vmul.f32 %v3476_v5, %v3078_v30 }
  0x98   : > { %v880_v54 = vadd.f32 %v810_v9, %v637_v1  ;;  %v5094_v14 = vrot.slane %v3298_v52, 1  ;;  %v1909_v46 = vrot.slane %v1786_v20, 2  ;;  %v649_v10 = vmul.f32 %v3483_v12, %v3078_v30 }
  0x99   : > { %v1360_v50 = vsel %vm740_vm2, %v5093_v26, %v1359_v27  ;;  %v890_v63 = vmul.f32 %v3496_v47, %v2875_v60  ;;  %v1488_v40 = vadd.f32 %v1456_v28, %v1422_v24  ;;  %v506_v8 = vrot.slane %v406_v25, 1  ;;  %v3637_v26 = vld [vmem:[%s2653_s18 + $0xb8] sm:$0x3] }
  0x9a   : > { %v1668_v35 = vsel %vm497_vm1, %v5094_v14, %v1667_v13  ;;  %v946_v61 = vadd.f32 %v914_v56, %v880_v54  ;;  %v958_v16 = vmul.f32 %v3503_v11, %v3094_v18  ;;  %v5095_v44 = vrot.slane %v3311_v34, 2  ;;  %5102 = vst [vmem:[#allocation13_spill] sm:$0xff] %v3637_v26 }
  0x9b   : > { %v749_v48 = vrot.slane %v649_v10, 2  ;;  %v1200_v2 = vmul.f32 %v3511_v53, %v3094_v18  ;;  %v1440_v30 = vmul.f32 %v3518_v58, %v3350_v55  ;;  %v1730_v60 = vadd.f32 %v1648_v59, %v1488_v40  ;;  %v5106_v10 = vld [vmem:[#allocation20_spill] sm:$0xff] }
  0x9c   : > { %v1910_v52 = vsel %vm740_vm2, %v5095_v44, %v1909_v46  ;;  %v1188_v28 = vadd.f32 %v1118_v23, %v946_v61  ;;  %v5096_v56 = vrot.slane %v3324_v62, 1  ;;  %v1057_v21 = vrot.slane %v958_v16, 1 }
  0x9d   : > { %v5097_v38 = vrot.slane %v3331_v22, 2  ;;  %v1299_v6 = vrot.slane %v1200_v2, 2  ;;  %v1508_v18 = vmul.f32 %v3525_v29, %v3601_v3  ;;  %v1972_v19 = vadd.f32 %v1890_v15, %v1730_v60 }
  0x9e   : > { %v507_v7 = vsel %vm497_vm1, %v5096_v56, %v506_v8  ;;  %v1430_v49 = vadd.f32 %v1360_v50, %v1188_v28  ;;  %v5098_v59 = vrot.slane %v3347_v41, 1  ;;  %v1750_v62 = vmul.f32 %v3582_v36, %v3601_v3  ;;  %v5103_v50 = vld [vmem:[#allocation14_spill] sm:$0xff] }
  0x9f   : > { %v613_v33 = vadd.f32 %v507_v7, %v338_v57  ;;  %v750_v34 = vsel %vm740_vm2, %v5097_v38, %v749_v48  ;;  %v5099_v9 = vrot.slane %v3359_v39, 2  ;;  %v1607_v27 = vrot.slane %v1508_v18, 1  ;;  %v5100_v57 = vld [vmem:[#allocation16_spill] sm:$0xff]  ;;  %v5108_v48 = vld [vmem:[#allocation17_spill] sm:$0xff]  ;;  %v5112_v18 = vld [vmem:[#allocation6_spill] sm:$0xff] }
  0xa0   : > { %v1058_v1 = vsel %vm497_vm1, %v5098_v59, %v1057_v21  ;;  %v346_v37 = vmul.f32 %v3465_v43, %v5046_v51  ;;  %v2008_v23 = vadd.f32 %v2832_v0, %v1972_v19  ;;  %v1496_v15 = vadd.f32 %v1464_v32, %v1430_v49  ;;  %v5104_v32 = vld [vmem:[#allocation3_spill] sm:$0xff]  ;;  %v5110_v21 = vld [vmem:[#allocation4_spill] sm:$0xff] }
  0xa1   : > { %v856_v45 = vadd.f32 %v750_v34, %v613_v33  ;;  %v1300_v22 = vsel %vm740_vm2, %v5099_v9, %v1299_v6  ;;  %v1849_v13 = vrot.slane %v1750_v62, 2  ;;  %v418_v41 = vmul.f32 %v3476_v5, %v3123_v31  ;;  %v5114_v9 = vld [vmem:[#allocation8_spill] sm:$0xff] }
  0xa2   : > { %v5101_v24 = vrot.slane %v5100_v57, 1  ;;  %v661_v39 = vmul.f32 %v3483_v12, %v3123_v31  ;;  %v898_v51 = vmul.f32 %v3496_v47, %v5103_v50  ;;  %2460 = vmatmul.msk.f32.gmra.mxu2 %vm2026_vm3, %v2008_v23  ;;  %v1738_v0 = vadd.f32 %v1668_v35, %v1496_v15  ;;  %v5107_v31 = vld [vmem:[#allocation7_spill] sm:$0xff]  ;;  %v5116_v15 = vld [vmem:[#allocation9_spill] sm:$0xff] }
  0xa3   : > { %v922_v20 = vadd.f32 %v890_v63, %v856_v45  ;;  %v5105_v25 = vrot.slane %v5104_v32, 2  ;;  %v526_v46 = vrot.slane %v418_v41, 1  ;;  %v970_v63 = vmul.f32 %v3503_v11, %v5106_v10 }
  0xa4   : > { %v1608_v54 = vsel %vm497_vm1, %v5101_v24, %v1607_v27  ;;  %v769_v61 = vrot.slane %v661_v39, 2  ;;  %v1212_v8 = vmul.f32 %v3511_v53, %v5106_v10  ;;  %v1448_v16 = vmul.f32 %v3518_v58, %v5107_v31  ;;  %v3683_v24 = vld [vmem:[%s2653_s18 + $0xf8] sm:$0xff] }
  0xa5   : > { %v1850_v14 = vsel %vm740_vm2, %v5105_v25, %v1849_v13  ;;  %v1164_v40 = vadd.f32 %v1058_v1, %v922_v20  ;;  %v1980_v44 = vadd.f32 %v1910_v52, %v1738_v0  ;;  %v5109_v2 = vrot.slane %v5108_v48, 1  ;;  %v3664_v52 = vld [vmem:[%s4827_s2] ss:$0 sm:$0xff]  ;;  %v5118_v25 = vld [vmem:[#allocation11_spill] sm:$0xff] }
  0xa6   : > { %v1077_v60 = vrot.slane %v970_v63, 1  ;;  %v1520_v28 = vmul.f32 %v3525_v29, %v3637_v26  ;;  %v5111_v33 = vrot.slane %v5110_v21, 2  ;;  %v1319_v34 = vrot.slane %v1212_v8, 2 }
  0xa7   : > { %v527_v35 = vsel %vm497_vm1, %v5109_v2, %v526_v46  ;;  %v1406_v56 = vadd.f32 %v1300_v22, %v1164_v40  ;;  %v2016_v6 = vadd.f32 %v3664_v52, %v1980_v44  ;;  %v5113_v19 = vrot.slane %v5112_v18, 1 }
  0xa8   : > { %v621_v7 = vadd.f32 %v527_v35, %v346_v37  ;;  %v770_v38 = vsel %vm740_vm2, %v5111_v33, %v769_v61  ;;  %v1627_v59 = vrot.slane %v1520_v28, 1  ;;  %v1762_v1 = vmul.f32 %v3582_v36, %v3637_v26  ;;  %v2511_v37 = vld [vmem:[%s2653_s18 + $0xf0] sm:$0xff]  ;;  %v3948_v26 = vld [vmem:[%s2653_s18 + $0xc0] sm:$0xff] }
  0xa9   : > { %v1078_v49 = vsel %vm497_vm1, %v5113_v19, %v1077_v60  ;;  %v1472_v62 = vadd.f32 %v1440_v30, %v1406_v56  ;;  %v5115_v22 = vrot.slane %v5114_v9, 2  ;;  %v355_v23 = vmul.f32 %v2511_v37, %v3465_v43  ;;  %2468 = vmatmul.msk.f32.gmra.mxu3 %vm2026_vm3, %v2016_v6  ;;  %v5120_v61 = vld [vmem:[#allocation12_spill] sm:$0xff]  ;;  %v5121_v60 = vld [vmem:[#allocation10_spill] sm:$0xff]  ;;  %5133 = vst [vmem:[#allocation6_spill] sm:$0xff] %v3948_v26 }
  0xaa   : > { %v864_v45 = vadd.f32 %v770_v38, %v621_v7  ;;  %v5117_v13 = vrot.slane %v5116_v15, 1  ;;  %v1869_v20 = vrot.slane %v1762_v1, 2  ;;  %v431_v57 = vmul.f32 %v2511_v37, %v3476_v5 }
  0xab   : > { %v1320_v27 = vsel %vm740_vm2, %v5115_v22, %v1319_v34  ;;  %v3687_v30 = vmul.f32 %v3683_v24, %v3476_v5  ;;  %v1714_v39 = vadd.f32 %v1608_v54, %v1472_v62  ;;  %v674_v0 = vmul.f32 %v2511_v37, %v3483_v12  ;;  %v3734_v22 = vld [vmem:[%s2653_s18 + $0x128] sm:$0xff] }
  0xac   : > { %v1628_v41 = vsel %vm497_vm1, %v5117_v13, %v1627_v59  ;;  %v930_v50 = vadd.f32 %v898_v51, %v864_v45  ;;  %v3692_v32 = vmul.f32 %v3683_v24, %v3483_v12  ;;  %v5119_v46 = vrot.slane %v5118_v25, 2  ;;  %v3723_v59 = vld [vmem:[%s2653_s18 + $0x120] sm:$0xff]  ;;  %5123 = vst [vmem:[#allocation19_spill] sm:$0xff] %v3734_v22 }
  0xad   : > { %v548_v63 = vrot.slane %v431_v57, 1  ;;  %v4947_v40 = vrot.slane %v3687_v30, 1  ;;  %v907_v8 = vmul.f32 %v3496_v47, %v5120_v61  ;;  %v1956_v44 = vadd.f32 %v1850_v14, %v1714_v39  ;;  %5122 = vst [vmem:[#allocation18_spill] sm:$0xff] %v3723_v59 }
  0xae   : > { %v1870_v10 = vsel %vm740_vm2, %v5119_v46, %v1869_v20  ;;  %v1172_v48 = vadd.f32 %v1078_v49, %v930_v50  ;;  %v791_v54 = vrot.slane %v674_v0, 2  ;;  %v4946_v51 = vrot.slane %v3692_v32, 2  ;;  %v2515_v50 = vld [vmem:[%s2653_s18 + $0x150] sm:$0xff] }
  0xaf   : > { %v550_v2 = vsel %vm497_vm1, %v548_v63, %v4947_v40  ;;  %v983_v35 = vmul.f32 %v3503_v11, %v5120_v61  ;;  %v3708_v28 = vmul.f32 %v3503_v11, %v5121_v60  ;;  %v1225_v56 = vmul.f32 %v3511_v53, %v5120_v61 }
  0xb0   : > { %v1992_v14 = vadd.f32 %v3664_v52, %v1956_v44  ;;  %v1414_v7 = vadd.f32 %v1320_v27, %v1172_v48  ;;  %v630_v21 = vadd.f32 %v550_v2, %v355_v23  ;;  %v793_v33 = vsel %vm740_vm2, %v791_v54, %v4946_v51 }
  0xb1   : > { %v1099_v38 = vrot.slane %v983_v35, 1  ;;  %v4945_v34 = vrot.slane %v3708_v28, 1  ;;  %v3719_v6 = vmul.f32 %v3511_v53, %v5121_v60  ;;  %v1341_v18 = vrot.slane %v1225_v56, 2  ;;  %v3774_v56 = vld [vmem:[%s2653_s18 + $0x180] sm:$0xff] }
  0xb2   : > { %2444 = vmatmul.msk.f32.gmra.mxu0 %vm2026_vm3, %v1992_v14  ;;  %v1480_v19 = vadd.f32 %v1448_v16, %v1414_v7  ;;  %v873_v49 = vadd.f32 %v793_v33, %v630_v21  ;;  %v1457_v1 = vmul.f32 %v3723_v59, %v3518_v58  ;;  %v1533_v62 = vmul.f32 %v3723_v59, %v3525_v29 }
  0xb3   : > { %v1101_v45 = vsel %vm497_vm1, %v1099_v38, %v4945_v34  ;;  %v4941_v9 = vrot.slane %v3719_v6, 2  ;;  %v3738_v16 = vmul.f32 %v3734_v22, %v3525_v29  ;;  %v1775_v27 = vmul.f32 %v3723_v59, %v3582_v36  ;;  %5124 = vst [vmem:[#allocation16_spill] sm:$0xff] %v3774_v56  ;;  %v5125_v38 = vld [vmem:[#allocation15_spill] sm:$0xff] }
  0xb4   : > { %v1722_v37 = vadd.f32 %v1628_v41, %v1480_v19  ;;  %v939_v23 = vadd.f32 %v907_v8, %v873_v49  ;;  %v1649_v15 = vrot.slane %v1533_v62, 1  ;;  %v3744_v13 = vmul.f32 %v3734_v22, %v3582_v36  ;;  %v3758_v8 = vld [vmem:[%s2653_s18 + $0x158] sm:$0xff]  ;;  %v3782_v49 = vld [vmem:[%s2653_s18 + $0x188] sm:$0xff] }
  0xb5   : > { %v1343_v20 = vsel %vm740_vm2, %v1341_v18, %v4941_v9  ;;  %v4940_v57 = vrot.slane %v3738_v16, 1  ;;  %v1891_v39 = vrot.slane %v1775_v27, 2  ;;  %v363_v0 = vmul.f32 %v2515_v50, %v3465_v43 }
  0xb6   : > { %v1964_v25 = vadd.f32 %v1870_v10, %v1722_v37  ;;  %v1181_v46 = vadd.f32 %v1101_v45, %v939_v23  ;;  %v4938_v41 = vrot.slane %v3744_v13, 2  ;;  %v443_v63 = vmul.f32 %v2515_v50, %v3476_v5 }
  0xb7   : > { %v1651_v61 = vsel %vm497_vm1, %v1649_v15, %v4940_v57  ;;  %v3762_v44 = vmul.f32 %v3758_v8, %v3476_v5  ;;  %v686_v48 = vmul.f32 %v2515_v50, %v3483_v12  ;;  %v3767_v10 = vmul.f32 %v3758_v8, %v3483_v12 }
  0xb8   : > { %v2000_v54 = vadd.f32 %v3664_v52, %v1964_v25  ;;  %v1423_v2 = vadd.f32 %v1343_v20, %v1181_v46  ;;  %v1893_v35 = vsel %vm740_vm2, %v1891_v39, %v4938_v41  ;;  %v568_v14 = vrot.slane %v443_v63, 1 }
  0xb9   : > { %v4937_v7 = vrot.slane %v3762_v44, 1  ;;  %v811_v21 = vrot.slane %v686_v48, 2  ;;  %v4936_v33 = vrot.slane %v3767_v10, 2  ;;  %v915_v18 = vmul.f32 %v3496_v47, %v5125_v38 }
  0xba   : > { %2452 = vmatmul.msk.f32.gmra.mxu1 %vm2026_vm3, %v2000_v54  ;;  %v1489_v19 = vadd.f32 %v1457_v1, %v1423_v2  ;;  %v995_v62 = vmul.f32 %v3503_v11, %v5125_v38  ;;  %v3788_v45 = vmul.f32 %v3503_v11, %v3270_v42  ;;  %v1237_v27 = vmul.f32 %v3511_v53, %v5125_v38 }
  0xbb   : > { %v570_v37 = vsel %vm497_vm1, %v568_v14, %v4937_v7  ;;  %v813_v1 = vsel %vm740_vm2, %v811_v21, %v4936_v33  ;;  %v3800_v23 = vmul.f32 %v3511_v53, %v3270_v42  ;;  %v1465_v15 = vmul.f32 %v3518_v58, %v3774_v56 }
  0xbc   : > { %v1731_v20 = vadd.f32 %v1651_v61, %v1489_v19  ;;  %v638_v39 = vadd.f32 %v570_v37, %v363_v0  ;;  %v1119_v50 = vrot.slane %v995_v62, 1  ;;  %v4935_v25 = vrot.slane %v3788_v45, 1 }
  0xbd   : > { %v1361_v46 = vrot.slane %v1237_v27, 2  ;;  %v4933_v63 = vrot.slane %v3800_v23, 2  ;;  %v1545_v48 = vmul.f32 %v3525_v29, %v3774_v56  ;;  %v3810_v54 = vmul.f32 %v3525_v29, %v3782_v49 }
  0xbe   : > { %v1973_v2 = vadd.f32 %v1893_v35, %v1731_v20  ;;  %v881_v14 = vadd.f32 %v813_v1, %v638_v39  ;;  %v1121_v0 = vsel %vm497_vm1, %v1119_v50, %v4935_v25  ;;  %v1787_v61 = vmul.f32 %v3582_v36, %v3774_v56  ;;  %v2517_v1 = vld [vmem:[%s2653_s18 + $0x30] sm:$0xff] }
  0xbf   : > { %v1363_v21 = vsel %vm740_vm2, %v1361_v46, %v4933_v63  ;;  %v1669_v38 = vrot.slane %v1545_v48, 1  ;;  %v4934_v19 = vrot.slane %v3810_v54, 1  ;;  %v3823_v62 = vmul.f32 %v3582_v36, %v3782_v49  ;;  %v3834_v48 = vld [vmem:[%s2653_s18 + $0x38] sm:$0xff] }
  0xc0   : > { %v2009_v35 = vadd.f32 %v3664_v52, %v1973_v2  ;;  %v947_v27 = vadd.f32 %v915_v18, %v881_v14  ;;  %v1911_v37 = vrot.slane %v1787_v61, 2  ;;  %v339_v20 = vmul.f32 %v2517_v1, %v3465_v43  ;;  %v5126_v61 = vld [vmem:[#allocation2_spill] sm:$0xff] }
  0xc1   : > { %v1671_v39 = vsel %vm497_vm1, %v1669_v38, %v4934_v19  ;;  %v4939_v50 = vrot.slane %v3823_v62, 2  ;;  %v407_v46 = vmul.f32 %v2517_v1, %v3476_v5  ;;  %v3838_v63 = vmul.f32 %v3834_v48, %v3476_v5 }
  0xc2   : > { %2461 = vmatmul.msk.f32.gmra.mxu2 %vm2026_vm3, %v2009_v35  ;;  %v1189_v18 = vadd.f32 %v1121_v0, %v947_v27  ;;  %v650_v2 = vmul.f32 %v2517_v1, %v3483_v12  ;;  %v3844_v14 = vmul.f32 %v3834_v48, %v3483_v12  ;;  %v891_v38 = vmul.f32 %v3496_v47, %v5126_v61 }
  0xc3   : > { %v1913_v19 = vsel %vm740_vm2, %v1911_v37, %v4939_v50  ;;  %v508_v25 = vrot.slane %v407_v46, 1  ;;  %v4942_v33 = vrot.slane %v3838_v63, 1  ;;  %v959_v0 = vmul.f32 %v3503_v11, %v5126_v61 }
  0xc4   : > { %v1431_v35 = vadd.f32 %v1363_v21, %v1189_v18  ;;  %v751_v27 = vrot.slane %v650_v2, 2  ;;  %v4943_v1 = vrot.slane %v3844_v14, 2  ;;  %v3857_v7 = vmul.f32 %v3503_v11, %v3350_v55 }
  0xc5   : > { %v510_v41 = vsel %vm497_vm1, %v508_v25, %v4942_v33  ;;  %v1059_v37 = vrot.slane %v959_v0, 1  ;;  %v1201_v46 = vmul.f32 %v3511_v53, %v5126_v61  ;;  %v3866_v50 = vmul.f32 %v3511_v53, %v3350_v55  ;;  %v3874_v0 = vld [vmem:[%s2653_s18 + $0x60] sm:$0xff] }
  0xc6   : > { %v1497_v21 = vadd.f32 %v1465_v15, %v1431_v35  ;;  %v614_v18 = vadd.f32 %v510_v41, %v339_v20  ;;  %v753_v2 = vsel %vm740_vm2, %v751_v27, %v4943_v1  ;;  %v4944_v57 = vrot.slane %v3857_v7, 1  ;;  %5127 = vst [vmem:[#allocation14_spill] sm:$0xff] %v3874_v0  ;;  %v3884_v35 = vld [vmem:[%s2653_s18 + $0x68] sm:$0xff] }
  0xc7   : > { %v1301_v9 = vrot.slane %v1201_v46, 2  ;;  %v4948_v25 = vrot.slane %v3866_v50, 2  ;;  %v1441_v61 = vmul.f32 %v3874_v0, %v3518_v58  ;;  %v1509_v33 = vmul.f32 %v3874_v0, %v3525_v29 }
  0xc8   : > { %v1739_v15 = vadd.f32 %v1671_v39, %v1497_v21  ;;  %v857_v41 = vadd.f32 %v753_v2, %v614_v18  ;;  %v1061_v20 = vsel %vm497_vm1, %v1059_v37, %v4944_v57  ;;  %v3888_v27 = vmul.f32 %v3884_v35, %v3525_v29  ;;  %v2521_v57 = vld [vmem:[%s2653_s18 + $0x90] sm:$0xff] }
  0xc9   : > { %v1303_v46 = vsel %vm740_vm2, %v1301_v9, %v4948_v25  ;;  %v1609_v1 = vrot.slane %v1509_v33, 1  ;;  %v1751_v39 = vmul.f32 %v3874_v0, %v3582_v36  ;;  %v3897_v21 = vmul.f32 %v3884_v35, %v3582_v36  ;;  %v3905_v33 = vld [vmem:[%s2653_s18 + $0x98] sm:$0xff] }
  0xca   : > { %v1981_v18 = vadd.f32 %v1913_v19, %v1739_v15  ;;  %v923_v37 = vadd.f32 %v891_v38, %v857_v41  ;;  %v4956_v2 = vrot.slane %v3888_v27, 1  ;;  %v347_v34 = vmul.f32 %v2521_v57, %v3465_v43 }
  0xcb   : > { %5128 = vst [vmem:[#allocation3_spill] sm:$0xff] %v3897_v21  ;;  %v1851_v51 = vrot.slane %v1751_v39, 2  ;;  %v4955_v40 = vrot.slane %v3897_v21, 2  ;;  %v419_v9 = vmul.f32 %v2521_v57, %v3476_v5  ;;  %v3909_v25 = vmul.f32 %v3905_v33, %v3476_v5 }
  0xcc   : > { %v2017_v0 = vadd.f32 %v3664_v52, %v1981_v18  ;;  %v1165_v19 = vadd.f32 %v1061_v20, %v923_v37  ;;  %v1611_v38 = vsel %vm497_vm1, %v1609_v1, %v4956_v2  ;;  %v662_v15 = vmul.f32 %v2521_v57, %v3483_v12  ;;  %v5131_v37 = vld [vmem:[#allocation5_spill] sm:$0xff] }
  0xcd   : > { %5129 = vst [vmem:[#allocation20_spill] sm:$0xff] %v3909_v25  ;;  %v1853_v41 = vsel %vm740_vm2, %v1851_v51, %v4955_v40  ;;  %v528_v39 = vrot.slane %v419_v9, 1  ;;  %v4957_v56 = vrot.slane %v3909_v25, 1  ;;  %v3922_v59 = vmul.f32 %v3905_v33, %v3483_v12 }
  0xce   : > { %2469 = vmatmul.msk.f32.gmra.mxu3 %vm2026_vm3, %v2017_v0  ;;  %v1407_v20 = vadd.f32 %v1303_v46, %v1165_v19  ;;  %v771_v18 = vrot.slane %v662_v15, 2  ;;  %v899_v1 = vmul.f32 %v3496_v47, %v5131_v37  ;;  %v971_v57 = vmul.f32 %v3503_v11, %v5131_v37 }
  0xcf   : > { %5130 = vst [vmem:[#allocation17_spill] sm:$0xff] %v3922_v59  ;;  %v530_v51 = vsel %vm497_vm1, %v528_v39, %v4957_v56  ;;  %v4963_v9 = vrot.slane %v3922_v59, 2  ;;  %v3935_v40 = vmul.f32 %v3503_v11, %v5107_v31  ;;  %v1213_v0 = vmul.f32 %v3511_v53, %v5131_v37 }
  0xd0   : > { %v1473_v46 = vadd.f32 %v1441_v61, %v1407_v20  ;;  %v622_v19 = vadd.f32 %v530_v51, %v347_v34  ;;  %v1079_v15 = vrot.slane %v971_v57, 1  ;;  %v3941_v2 = vmul.f32 %v3511_v53, %v5107_v31  ;;  %v3959_v57 = vld [vmem:[%s2653_s18 + $0xc8] sm:$0xff]  ;;  %v2525_v31 = vld [vmem:[%s2653_s18 + $0x100] sm:$0x3] }
  0xd1   : > { %5132 = vst [vmem:[#allocation4_spill] sm:$0xff] %v3935_v40  ;;  %v773_v39 = vsel %vm740_vm2, %v771_v18, %v4963_v9  ;;  %v4962_v56 = vrot.slane %v3935_v40, 1  ;;  %v1321_v25 = vrot.slane %v1213_v0, 2  ;;  %v1449_v21 = vmul.f32 %v3948_v26, %v3518_v58 }
  0xd2   : > { %v1715_v37 = vadd.f32 %v1611_v38, %v1473_v46  ;;  %v865_v61 = vadd.f32 %v773_v39, %v622_v19  ;;  %v4973_v34 = vrot.slane %v3941_v2, 2  ;;  %v1521_v20 = vmul.f32 %v3948_v26, %v3525_v29  ;;  %5134 = vst [vmem:[#allocation8_spill] sm:$0xff] %v3959_v57 }
  0xd3   : > { %v1081_v18 = vsel %vm497_vm1, %v1079_v15, %v4962_v56  ;;  %v3963_v51 = vmul.f32 %v3959_v57, %v3525_v29  ;;  %v1763_v38 = vmul.f32 %v3948_v26, %v3582_v36  ;;  %v3969_v0 = vmul.f32 %v3959_v57, %v3582_v36 }
  0xd4   : > { %v1957_v46 = vadd.f32 %v1853_v41, %v1715_v37  ;;  %v931_v19 = vadd.f32 %v899_v1, %v865_v61  ;;  %v1323_v39 = vsel %vm740_vm2, %v1321_v25, %v4973_v34  ;;  %v1629_v15 = vrot.slane %v1521_v20, 1 }
  0xd5   : > { %5135 = vst [vmem:[#allocation9_spill] sm:$0xff] %v3969_v0  ;;  %v4972_v56 = vrot.slane %v3963_v51, 1  ;;  %v1871_v9 = vrot.slane %v1763_v38, 2  ;;  %v4971_v40 = vrot.slane %v3969_v0, 2  ;;  %v356_v59 = vmul.f32 %v3683_v24, %v3465_v43 }
  0xd6   : > { %v1993_v26 = vadd.f32 %v3664_v52, %v1957_v46  ;;  %v1173_v57 = vadd.f32 %v1081_v18, %v931_v19  ;;  %v433_v41 = vmul.f32 %v2525_v31, %v3476_v5  ;;  %v676_v1 = vmul.f32 %v2525_v31, %v3483_v12 }
  0xd7   : > { %v1631_v25 = vsel %vm497_vm1, %v1629_v15, %v4972_v56  ;;  %v1873_v37 = vsel %vm740_vm2, %v1871_v9, %v4971_v40  ;;  %v908_v24 = vmul.f32 %v3496_v47, %v5121_v60  ;;  %v985_v61 = vmul.f32 %v3503_v11, %v3471_v17  ;;  %v3998_v9 = vld [vmem:[%s2653_s18 + $0x130] sm:$0x3] }
  0xd8   : > { %2445 = vmatmul.msk.f32.gmra.mxu0 %vm2026_vm3, %v1993_v26  ;;  %v1415_v20 = vadd.f32 %v1323_v39, %v1173_v57  ;;  %v551_v18 = vrot.slane %v433_v41, 1  ;;  %v794_v38 = vrot.slane %v676_v1, 2  ;;  %v1227_v31 = vmul.f32 %v3511_v53, %v3471_v17 }
  0xd9   : > { %v1102_v46 = vrot.slane %v985_v61, 1  ;;  %v1458_v19 = vmul.f32 %v3734_v22, %v3518_v58  ;;  %v1535_v60 = vmul.f32 %v3998_v9, %v3525_v29  ;;  %v1777_v15 = vmul.f32 %v3998_v9, %v3582_v36 }
  0xda   : > { %v1481_v26 = vadd.f32 %v1449_v21, %v1415_v20  ;;  %v5136_v57 = vrot.slane %v3687_v30, 1  ;;  %v5137_v17 = vrot.slane %v3692_v32, 2  ;;  %v1344_v1 = vrot.slane %v1227_v31, 2 }
  0xdb   : > { %v5138_v40 = vrot.slane %v3708_v28, 1  ;;  %v1652_v34 = vrot.slane %v1535_v60, 1  ;;  %v1894_v22 = vrot.slane %v1777_v15, 2  ;;  %v5139_v21 = vrot.slane %v3719_v6, 2 }
  0xdc   : > { %v552_v39 = vsel %vm497_vm1, %v5136_v57, %v551_v18  ;;  %v795_v41 = vsel %vm740_vm2, %v5137_v17, %v794_v38  ;;  %v1723_v0 = vadd.f32 %v1631_v25, %v1481_v26  ;;  %v364_v20 = vmul.f32 %v3758_v8, %v3465_v43  ;;  %v2527_v18 = vld [vmem:[%s2653_s18 + $0x160] sm:$0x3]  ;;  %v4027_v25 = vld [vmem:[%s2653_s18 + $0x190] sm:$0x3] }
  0xdd   : > { %v631_v61 = vadd.f32 %v552_v39, %v356_v59  ;;  %v1103_v56 = vsel %vm497_vm1, %v5138_v40, %v1102_v46  ;;  %v1345_v30 = vsel %vm740_vm2, %v5139_v21, %v1344_v1  ;;  %v445_v32 = vmul.f32 %v2527_v18, %v3476_v5 }
  0xde   : > { %v5140_v59 = vrot.slane %v3738_v16, 1  ;;  %v5141_v40 = vrot.slane %v3744_v13, 2  ;;  %v688_v6 = vmul.f32 %v2527_v18, %v3483_v12  ;;  %v1965_v46 = vadd.f32 %v1873_v37, %v1723_v0 }
  0xdf   : > { %v874_v38 = vadd.f32 %v795_v41, %v631_v61  ;;  %v571_v60 = vrot.slane %v445_v32, 1  ;;  %v916_v8 = vmul.f32 %v3496_v47, %v3270_v42  ;;  %v997_v15 = vmul.f32 %v3503_v11, %v3554_v4 }
  0xe0   : > { %v1653_v28 = vsel %vm497_vm1, %v5140_v59, %v1652_v34  ;;  %v1895_v31 = vsel %vm740_vm2, %v5141_v40, %v1894_v22  ;;  %v814_v16 = vrot.slane %v688_v6, 2  ;;  %v1239_v34 = vmul.f32 %v3511_v53, %v3554_v4 }
  0xe1   : > { %v940_v26 = vadd.f32 %v908_v24, %v874_v38  ;;  %v1466_v22 = vmul.f32 %v3518_v58, %v3782_v49  ;;  %v2001_v13 = vadd.f32 %v3664_v52, %v1965_v46  ;;  %v5142_v57 = vrot.slane %v3762_v44, 1  ;;  %v2528_v38 = vld [vmem:[%s2653_s18 + $0x40] sm:$0x3] }
  0xe2   : > { %v1122_v37 = vrot.slane %v997_v15, 1  ;;  %v1547_v42 = vmul.f32 %v3525_v29, %v4027_v25  ;;  %v5143_v17 = vrot.slane %v3767_v10, 2  ;;  %v1364_v41 = vrot.slane %v1239_v34, 2 }
  0xe3   : > { %v572_v0 = vsel %vm497_vm1, %v5142_v57, %v571_v60  ;;  %v1182_v39 = vadd.f32 %v1103_v56, %v940_v26  ;;  %2453 = vmatmul.msk.f32.gmra.mxu1 %vm2026_vm3, %v2001_v13  ;;  %v5144_v1 = vrot.slane %v3788_v45, 1  ;;  %v1789_v21 = vmul.f32 %v3582_v36, %v4027_v25 }
  0xe4   : > { %v639_v24 = vadd.f32 %v572_v0, %v364_v20  ;;  %v815_v4 = vsel %vm740_vm2, %v5143_v17, %v814_v16  ;;  %v1672_v61 = vrot.slane %v1547_v42, 1  ;;  %v340_v18 = vmul.f32 %v3834_v48, %v3465_v43 }
  0xe5   : > { %v1123_v44 = vsel %vm497_vm1, %v5144_v1, %v1122_v37  ;;  %v1424_v56 = vadd.f32 %v1345_v30, %v1182_v39  ;;  %v5145_v10 = vrot.slane %v3800_v23, 2  ;;  %v409_v59 = vmul.f32 %v2528_v38, %v3476_v5 }
  0xe6   : > { %v882_v20 = vadd.f32 %v815_v4, %v639_v24  ;;  %v5146_v45 = vrot.slane %v3810_v54, 1  ;;  %v1914_v6 = vrot.slane %v1789_v21, 2  ;;  %v652_v46 = vmul.f32 %v2528_v38, %v3483_v12  ;;  %v4082_v24 = vld [vmem:[%s2653_s18 + $0x70] sm:$0x3] }
  0xe7   : > { %v1365_v32 = vsel %vm740_vm2, %v5145_v10, %v1364_v41  ;;  %v892_v60 = vmul.f32 %v3496_v47, %v3350_v55  ;;  %v1490_v48 = vadd.f32 %v1458_v19, %v1424_v56  ;;  %v511_v15 = vrot.slane %v409_v59, 1  ;;  %v5153_v59 = vld [vmem:[#allocation7_spill] sm:$0xff] }
  0xe8   : > { %v1673_v40 = vsel %vm497_vm1, %v5146_v45, %v1672_v61  ;;  %v948_v30 = vadd.f32 %v916_v8, %v882_v20  ;;  %v961_v23 = vmul.f32 %v3503_v11, %v3601_v3  ;;  %v5147_v26 = vrot.slane %v3823_v62, 2  ;;  %v2530_v20 = vld [vmem:[%s2653_s18 + $0xa0] sm:$0x3] }
  0xe9   : > { %v754_v54 = vrot.slane %v652_v46, 2  ;;  %v1203_v34 = vmul.f32 %v3511_v53, %v3601_v3  ;;  %v1442_v13 = vmul.f32 %v3884_v35, %v3518_v58  ;;  %v1732_v57 = vadd.f32 %v1653_v28, %v1490_v48 }
  0xea   : > { %v1915_v16 = vsel %vm740_vm2, %v5147_v26, %v1914_v6  ;;  %v1190_v55 = vadd.f32 %v1123_v44, %v948_v30  ;;  %v5148_v19 = vrot.slane %v3838_v63, 1  ;;  %v1062_v0 = vrot.slane %v961_v23, 1  ;;  %v5154_v6 = vld [vmem:[#allocation3_spill] sm:$0xff]  ;;  %v5156_v30 = vld [vmem:[#allocation13_spill] sm:$0xff]  ;;  %v5157_v26 = vld [vmem:[#allocation8_spill] sm:$0xff] }
  0xeb   : > { %v5149_v42 = vrot.slane %v3844_v14, 2  ;;  %v1304_v39 = vrot.slane %v1203_v34, 2  ;;  %v1511_v3 = vmul.f32 %v4082_v24, %v3525_v29  ;;  %v1974_v17 = vadd.f32 %v1895_v31, %v1732_v57  ;;  %v5158_v57 = vld [vmem:[#allocation20_spill] sm:$0xff] }
  0xec   : > { %v512_v8 = vsel %vm497_vm1, %v5148_v19, %v511_v15  ;;  %v1432_v28 = vadd.f32 %v1365_v32, %v1190_v55  ;;  %v5150_v4 = vrot.slane %v3857_v7, 1  ;;  %v1753_v41 = vmul.f32 %v4082_v24, %v3582_v36 }
  0xed   : > { %v615_v37 = vadd.f32 %v512_v8, %v340_v18  ;;  %v755_v62 = vsel %vm740_vm2, %v5149_v42, %v754_v54  ;;  %v5151_v14 = vrot.slane %v3866_v50, 2  ;;  %v1612_v61 = vrot.slane %v1511_v3, 1  ;;  %v4119_v8 = vld [vmem:[%s2653_s18 + $0xd0] sm:$0x3] }
  0xee   : > { %v1063_v63 = vsel %vm497_vm1, %v5150_v4, %v1062_v0  ;;  %v348_v21 = vmul.f32 %v3905_v33, %v3465_v43  ;;  %v2010_v18 = vadd.f32 %v3664_v52, %v1974_v17  ;;  %v1498_v31 = vadd.f32 %v1466_v22, %v1432_v28  ;;  %5160 = vst [vmem:[#allocation11_spill] sm:$0xff] %v4119_v8  ;;  %v5163_v28 = vld [vmem:[#allocation4_spill] sm:$0xff] }
  0xef   : > { %v858_v1 = vadd.f32 %v755_v62, %v615_v37  ;;  %v1305_v44 = vsel %vm740_vm2, %v5151_v14, %v1304_v39  ;;  %v1854_v56 = vrot.slane %v1753_v41, 2  ;;  %v421_v7 = vmul.f32 %v2530_v20, %v3476_v5  ;;  %v5161_v62 = vld [vmem:[#allocation17_spill] sm:$0xff] }
  0xf0   : > { %v5152_v32 = vrot.slane %v3888_v27, 1  ;;  %v664_v50 = vmul.f32 %v2530_v20, %v3483_v12  ;;  %v900_v45 = vmul.f32 %v3496_v47, %v5153_v59  ;;  %2462 = vmatmul.msk.f32.gmra.mxu2 %vm2026_vm3, %v2010_v18  ;;  %v1740_v33 = vadd.f32 %v1673_v40, %v1498_v31  ;;  %v2532_v18 = vld [vmem:[%s2653_s18 + $0x108] sm:$0xff] }
  0xf1   : > { %v924_v10 = vadd.f32 %v892_v60, %v858_v1  ;;  %v5155_v22 = vrot.slane %v5154_v6, 2  ;;  %v531_v48 = vrot.slane %v421_v7, 1  ;;  %v973_v60 = vmul.f32 %v3503_v11, %v5156_v30 }
  0xf2   : > { %v1613_v38 = vsel %vm497_vm1, %v5152_v32, %v1612_v61  ;;  %v774_v15 = vrot.slane %v664_v50, 2  ;;  %v1215_v23 = vmul.f32 %v3511_v53, %v5156_v30  ;;  %v1450_v54 = vmul.f32 %v5157_v26, %v3518_v58  ;;  %v4143_v32 = vld [vmem:[%s2653_s18 + $0x110] sm:$0xff] }
  0xf3   : > { %v1855_v46 = vsel %vm740_vm2, %v5155_v22, %v1854_v56  ;;  %v1166_v27 = vadd.f32 %v1063_v63, %v924_v10  ;;  %v1982_v34 = vadd.f32 %v1915_v16, %v1740_v33  ;;  %v5159_v55 = vrot.slane %v5158_v57, 1 }
  0xf4   : > { %v1082_v19 = vrot.slane %v973_v60, 1  ;;  %v1523_v0 = vmul.f32 %v4119_v8, %v3525_v29  ;;  %v5162_v39 = vrot.slane %v5161_v62, 2  ;;  %v1324_v17 = vrot.slane %v1215_v23, 2  ;;  %v5169_v60 = vld [vmem:[#allocation18_spill] sm:$0xff] }
  0xf5   : > { %v532_v40 = vsel %vm497_vm1, %v5159_v55, %v531_v48  ;;  %v1408_v37 = vadd.f32 %v1305_v44, %v1166_v27  ;;  %v2018_v16 = vadd.f32 %v3664_v52, %v1982_v34  ;;  %v5164_v4 = vrot.slane %v5163_v28, 1  ;;  %v5170_v55 = vld [vmem:[#allocation19_spill] sm:$0xff] }
  0xf6   : > { %v623_v42 = vadd.f32 %v532_v40, %v348_v21  ;;  %v775_v3 = vsel %vm740_vm2, %v5162_v39, %v774_v15  ;;  %v1632_v41 = vrot.slane %v1523_v0, 1  ;;  %v1765_v1 = vmul.f32 %v4119_v8, %v3582_v36 }
  0xf7   : > { %v1083_v63 = vsel %vm497_vm1, %v5164_v4, %v1082_v19  ;;  %v1474_v14 = vadd.f32 %v1442_v13, %v1408_v37  ;;  %v5165_v44 = vrot.slane %v3941_v2, 2  ;;  %v357_v31 = vmul.f32 %v2532_v18, %v3465_v43  ;;  %2470 = vmatmul.msk.f32.gmra.mxu3 %vm2026_vm3, %v2018_v16  ;;  %v2534_v4 = vld [vmem:[%s2653_s18 + $0x138] sm:$0xff] }
  0xf8   : > { %v866_v61 = vadd.f32 %v775_v3, %v623_v42  ;;  %v5166_v56 = vrot.slane %v3963_v51, 1  ;;  %v1874_v7 = vrot.slane %v1765_v1, 2  ;;  %v434_v10 = vmul.f32 %v2532_v18, %v3476_v5  ;;  %v5167_v51 = vld [vmem:[#allocation9_spill] sm:$0xff] }
  0xf9   : > { %v1325_v21 = vsel %vm740_vm2, %v5165_v44, %v1324_v17  ;;  %v4147_v13 = vmul.f32 %v4143_v32, %v3476_v5  ;;  %v1716_v2 = vadd.f32 %v1613_v38, %v1474_v14  ;;  %v677_v59 = vmul.f32 %v2532_v18, %v3483_v12 }
  0xfa   : > { %v1633_v20 = vsel %vm497_vm1, %v5166_v56, %v1632_v41  ;;  %v932_v50 = vadd.f32 %v900_v45, %v866_v61  ;;  %v4152_v33 = vmul.f32 %v4143_v32, %v3483_v12  ;;  %v5168_v6 = vrot.slane %v5167_v51, 2  ;;  %v4190_v61 = vld [vmem:[%s2653_s18 + $0x140] sm:$0xff] }
  0xfb   : > { %v553_v48 = vrot.slane %v434_v10, 1  ;;  %v4995_v30 = vrot.slane %v4147_v13, 1  ;;  %v909_v27 = vmul.f32 %v5169_v60, %v3496_v47  ;;  %v1958_v15 = vadd.f32 %v1855_v46, %v1716_v2 }
  0xfc   : > { %v1875_v22 = vsel %vm740_vm2, %v5168_v6, %v1874_v7  ;;  %v1174_v23 = vadd.f32 %v1083_v63, %v932_v50  ;;  %v796_v38 = vrot.slane %v677_v59, 2  ;;  %v4990_v45 = vrot.slane %v4152_v33, 2  ;;  %v2536_v50 = vld [vmem:[%s2653_s18 + $0x168] sm:$0xff] }
  0xfd   : > { %v555_v34 = vsel %vm497_vm1, %v553_v48, %v4995_v30  ;;  %v986_v57 = vmul.f32 %v5169_v60, %v3503_v11  ;;  %v4168_v40 = vmul.f32 %v5170_v55, %v3503_v11  ;;  %v1228_v19 = vmul.f32 %v5169_v60, %v3511_v53 }
  0xfe   : > { %v1994_v46 = vadd.f32 %v3664_v52, %v1958_v15  ;;  %v1416_v0 = vadd.f32 %v1325_v21, %v1174_v23  ;;  %v632_v37 = vadd.f32 %v555_v34, %v357_v31  ;;  %v798_v42 = vsel %vm740_vm2, %v796_v38, %v4990_v45 }
  0xff   : > { %v1104_v62 = vrot.slane %v986_v57, 1  ;;  %v4989_v39 = vrot.slane %v4168_v40, 1  ;;  %v4179_v3 = vmul.f32 %v5170_v55, %v3511_v53  ;;  %v1346_v17 = vrot.slane %v1228_v19, 2  ;;  %v330_v57 = vld [vmem:[%s2653_s18 + $0x198] sm:$0xff] }
 0x100   : > { %2446 = vmatmul.msk.f32.gmra.mxu0 %vm2026_vm3, %v1994_v46  ;;  %v1482_v16 = vadd.f32 %v1450_v54, %v1416_v0  ;;  %v875_v28 = vadd.f32 %v798_v42, %v632_v37  ;;  %v1459_v63 = vmul.f32 %v2534_v4, %v3518_v58  ;;  %v1536_v41 = vmul.f32 %v2534_v4, %v3525_v29  ;;  %v5171_v37 = vld [vmem:[#allocation16_spill] sm:$0xff] }
 0x101   : > { %v1106_v1 = vsel %vm497_vm1, %v1104_v62, %v4989_v39  ;;  %v4988_v14 = vrot.slane %v4179_v3, 2  ;;  %v4194_v44 = vmul.f32 %v4190_v61, %v3525_v29  ;;  %v1778_v54 = vmul.f32 %v2534_v4, %v3582_v36  ;;  %v4235_v62 = vld [vmem:[%s2653_s18 + $0x1a0] sm:$0xff] }
 0x102   : > { %v1724_v21 = vadd.f32 %v1633_v20, %v1482_v16  ;;  %v941_v18 = vadd.f32 %v909_v27, %v875_v28  ;;  %v1654_v31 = vrot.slane %v1536_v41, 1  ;;  %v4199_v56 = vmul.f32 %v4190_v61, %v3582_v36  ;;  %v4213_v27 = vld [vmem:[%s2653_s18 + $0x170] sm:$0xff] }
 0x103   : > { %v1348_v7 = vsel %vm740_vm2, %v1346_v17, %v4988_v14  ;;  %v4986_v10 = vrot.slane %v4194_v44, 1  ;;  %v1896_v2 = vrot.slane %v1778_v54, 2  ;;  %v365_v59 = vmul.f32 %v2536_v50, %v3465_v43 }
 0x104   : > { %v1966_v51 = vadd.f32 %v1875_v22, %v1724_v21  ;;  %v1183_v6 = vadd.f32 %v1106_v1, %v941_v18  ;;  %v4985_v20 = vrot.slane %v4199_v56, 2  ;;  %v446_v48 = vmul.f32 %v2536_v50, %v3476_v5 }
 0x105   : > { %v1656_v60 = vsel %vm497_vm1, %v1654_v31, %v4986_v10  ;;  %v4217_v15 = vmul.f32 %v4213_v27, %v3476_v5  ;;  %v689_v23 = vmul.f32 %v2536_v50, %v3483_v12  ;;  %v4222_v43 = vmul.f32 %v4213_v27, %v3483_v12 }
 0x106   : > { %v2002_v22 = vadd.f32 %v3664_v52, %v1966_v51  ;;  %v1425_v38 = vadd.f32 %v1348_v7, %v1183_v6  ;;  %v1898_v34 = vsel %vm740_vm2, %v1896_v2, %v4985_v20  ;;  %v573_v19 = vrot.slane %v446_v48, 1 }
 0x107   : > { %v4984_v46 = vrot.slane %v4217_v15, 1  ;;  %v816_v0 = vrot.slane %v689_v23, 2  ;;  %v4982_v5 = vrot.slane %v4222_v43, 2  ;;  %v917_v42 = vmul.f32 %v3496_v47, %v5171_v37 }
 0x108   : > { %2454 = vmatmul.msk.f32.gmra.mxu1 %vm2026_vm3, %v2002_v22  ;;  %v1491_v12 = vadd.f32 %v1459_v63, %v1425_v38  ;;  %v998_v17 = vmul.f32 %v3503_v11, %v5171_v37  ;;  %v4241_v16 = vmul.f32 %v3503_v11, %v3782_v49  ;;  %v1240_v28 = vmul.f32 %v3511_v53, %v5171_v37  ;;  %v4279_v38 = vld [vmem:[%s4826_s1] ss:$0 sm:$0xff]  ;;  %v4290_v37 = vld [vmem:[%s4826_s1 + $0x1] ss:$0 sm:$0xff] }
 0x109   : > { %v575_v4 = vsel %vm497_vm1, %v573_v19, %v4984_v46  ;;  %v818_v47 = vsel %vm740_vm2, %v816_v0, %v4982_v5  ;;  %v4253_v63 = vmul.f32 %v3511_v53, %v3782_v49  ;;  %v1467_v41 = vmul.f32 %v3518_v58, %v330_v57 }
 0x10a   : > { %v1733_v1 = vadd.f32 %v1656_v60, %v1491_v12  ;;  %v640_v11 = vadd.f32 %v575_v4, %v365_v59  ;;  %v1124_v54 = vrot.slane %v998_v17, 1  ;;  %v4981_v21 = vrot.slane %v4241_v16, 1  ;;  %v4294_v12 = vld [vmem:[%s2653_s18 + $0x50] sm:$0xff]  ;;  %v4304_v4 = vld [vmem:[%s4826_s1 + $0x2] ss:$0 sm:$0xff] }
 0x10b   : > { %v1366_v18 = vrot.slane %v1240_v28, 2  ;;  %v4980_v31 = vrot.slane %v4253_v63, 2  ;;  %v1548_v7 = vmul.f32 %v3525_v29, %v330_v57  ;;  %v4261_v2 = vmul.f32 %v3525_v29, %v4235_v62 }
 0x10c   : > { %v1975_v50 = vadd.f32 %v1898_v34, %v1733_v1  ;;  %v883_v53 = vadd.f32 %v818_v47, %v640_v11  ;;  %v1126_v58 = vsel %vm497_vm1, %v1124_v54, %v4981_v21  ;;  %v1790_v59 = vmul.f32 %v3582_v36, %v330_v57  ;;  %v2539_v34 = vld [vmem:[%s2653_s18 + $0x48] sm:$0xff]  ;;  %v4314_v11 = vld [vmem:[%s4826_s1 + $0x3] ss:$0 sm:$0xff]  ;;  %v2547_v21 = vld [vmem:[%s2653_s18 + $0x78] sm:$0xff] }
 0x10d   : > { %v1368_v51 = vsel %vm740_vm2, %v1366_v18, %v4980_v31  ;;  %v1674_v6 = vrot.slane %v1548_v7, 1  ;;  %v4978_v48 = vrot.slane %v4261_v2, 1  ;;  %v4273_v29 = vmul.f32 %v3582_v36, %v4235_v62  ;;  %v5172_v54 = vld [vmem:[#allocation14_spill] sm:$0xff] }
 0x10e   : > { %v2011_v60 = vadd.f32 %v3664_v52, %v1975_v50  ;;  %v949_v23 = vadd.f32 %v917_v42, %v883_v53  ;;  %v1916_v22 = vrot.slane %v1790_v59, 2  ;;  %v341_v57 = vmul.f32 %v2539_v34, %v4279_v38 }
 0x10f   : > { %v1676_v19 = vsel %vm497_vm1, %v1674_v6, %v4978_v48  ;;  %v4977_v0 = vrot.slane %v4273_v29, 2  ;;  %v410_v42 = vmul.f32 %v4290_v37, %v2539_v34  ;;  %v4298_v17 = vmul.f32 %v4294_v12, %v4290_v37 }
 0x110   : > { %2463 = vmatmul.msk.f32.gmra.mxu2 %vm2026_vm3, %v2011_v60  ;;  %v1191_v28 = vadd.f32 %v1126_v58, %v949_v23  ;;  %v653_v47 = vmul.f32 %v4304_v4, %v2539_v34  ;;  %v4309_v1 = vmul.f32 %v4304_v4, %v4294_v12  ;;  %v893_v18 = vmul.f32 %v4314_v11, %v5172_v54  ;;  %v4325_v58 = vld [vmem:[%s4826_s1 + $0x4] ss:$0 sm:$0xff] }
 0x111   : > { %v1918_v7 = vsel %vm740_vm2, %v1916_v22, %v4977_v0  ;;  %v513_v50 = vrot.slane %v410_v42, 1  ;;  %v4979_v53 = vrot.slane %v4298_v17, 1  ;;  %v962_v59 = vmul.f32 %v4325_v58, %v5172_v54  ;;  %v4340_v0 = vld [vmem:[%s4826_s1 + $0x5] ss:$0 sm:$0xff] }
 0x112   : > { %v1433_v6 = vadd.f32 %v1368_v51, %v1191_v28  ;;  %v756_v60 = vrot.slane %v653_v47, 2  ;;  %v4983_v23 = vrot.slane %v4309_v1, 2  ;;  %v4332_v34 = vmul.f32 %v4325_v58, %v3884_v35 }
 0x113   : > { %v515_v22 = vsel %vm497_vm1, %v513_v50, %v4979_v53  ;;  %v1064_v42 = vrot.slane %v962_v59, 1  ;;  %v1204_v51 = vmul.f32 %v4340_v0, %v5172_v54  ;;  %v4346_v28 = vmul.f32 %v4340_v0, %v3884_v35  ;;  %v4356_v54 = vld [vmem:[%s4826_s1 + $0x6] ss:$0 sm:$0xff] }
 0x114   : > { %v1499_v47 = vadd.f32 %v1467_v41, %v1433_v6  ;;  %v616_v48 = vadd.f32 %v515_v22, %v341_v57  ;;  %v758_v50 = vsel %vm740_vm2, %v756_v60, %v4983_v23  ;;  %v4987_v59 = vrot.slane %v4332_v34, 1  ;;  %v4363_v41 = vld [vmem:[%s4826_s1 + $0x7] ss:$0 sm:$0xff] }
 0x115   : > { %v1306_v53 = vrot.slane %v1204_v51, 2  ;;  %v4991_v31 = vrot.slane %v4346_v28, 2  ;;  %v1443_v5 = vmul.f32 %v2547_v21, %v4356_v54  ;;  %v1512_v57 = vmul.f32 %v4363_v41, %v2547_v21  ;;  %v4370_v51 = vld [vmem:[%s2653_s18 + $0x80] sm:$0xff] }
 0x116   : > { %v1741_v6 = vadd.f32 %v1676_v19, %v1499_v47  ;;  %v859_v60 = vadd.f32 %v758_v50, %v616_v48  ;;  %v1066_v22 = vsel %vm497_vm1, %v1064_v42, %v4987_v59  ;;  %v4374_v23 = vmul.f32 %v4370_v51, %v4363_v41  ;;  %v2550_v50 = vld [vmem:[%s2653_s18 + $0xa8] sm:$0xff] }
 0x117   : > { %v1308_v46 = vsel %vm740_vm2, %v1306_v53, %v4991_v31  ;;  %v1614_v20 = vrot.slane %v1512_v57, 1  ;;  %v1754_v10 = vmul.f32 %v2547_v21, %v3582_v36  ;;  %v4382_v48 = vmul.f32 %v4370_v51, %v3582_v36  ;;  %v4390_v53 = vld [vmem:[%s2653_s18 + $0xb0] sm:$0xff] }
 0x118   : > { %5173 = vst [vmem:[#allocation12_spill] sm:$0xff] %v4374_v23  ;;  %v1983_v19 = vadd.f32 %v1918_v7, %v1741_v6  ;;  %v925_v47 = vadd.f32 %v893_v18, %v859_v60  ;;  %v4993_v42 = vrot.slane %v4374_v23, 1  ;;  %v349_v59 = vmul.f32 %v2550_v50, %v4279_v38 }
 0x119   : > { %5174 = vst [vmem:[#allocation10_spill] sm:$0xff] %v4382_v48  ;;  %v1856_v14 = vrot.slane %v1754_v10, 2  ;;  %v4992_v39 = vrot.slane %v4382_v48, 2  ;;  %v422_v45 = vmul.f32 %v2550_v50, %v4290_v37  ;;  %v4394_v21 = vmul.f32 %v4390_v53, %v4290_v37 }
 0x11a   : > { %v2019_v36 = vadd.f32 %v3664_v52, %v1983_v19  ;;  %v1167_v7 = vadd.f32 %v1066_v22, %v925_v47  ;;  %v1616_v18 = vsel %vm497_vm1, %v1614_v20, %v4993_v42  ;;  %v665_v57 = vmul.f32 %v2550_v50, %v4304_v4  ;;  %v5177_v47 = vld [vmem:[#allocation6_spill] sm:$0xff] }
 0x11b   : > { %5175 = vst [vmem:[#allocation15_spill] sm:$0xff] %v4394_v21  ;;  %v1858_v10 = vsel %vm740_vm2, %v1856_v14, %v4992_v39  ;;  %v533_v6 = vrot.slane %v422_v45, 1  ;;  %v4994_v60 = vrot.slane %v4394_v21, 1  ;;  %v4407_v31 = vmul.f32 %v4390_v53, %v4304_v4  ;;  %v2552_v21 = vld [vmem:[%s2653_s18 + $0xd8] sm:$0xff] }
 0x11c   : > { %2471 = vmatmul.msk.f32.gmra.mxu3 %vm2026_vm3, %v2019_v36  ;;  %v1409_v22 = vadd.f32 %v1308_v46, %v1167_v7  ;;  %v776_v19 = vrot.slane %v665_v57, 2  ;;  %v901_v20 = vmul.f32 %v4314_v11, %v5177_v47  ;;  %v974_v50 = vmul.f32 %v4325_v58, %v5177_v47 }
 0x11d   : > { %5176 = vst [vmem:[#allocation2_spill] sm:$0xff] %v4407_v31  ;;  %v535_v45 = vsel %vm497_vm1, %v533_v6, %v4994_v60  ;;  %v5002_v14 = vrot.slane %v4407_v31, 2  ;;  %v4420_v39 = vmul.f32 %v4325_v58, %v5157_v26  ;;  %v1216_v46 = vmul.f32 %v4340_v0, %v5177_v47  ;;  %v4440_v47 = vld [vmem:[%s2653_s18 + $0xe0] sm:$0xff] }
 0x11e   : > { %v1475_v36 = vadd.f32 %v1443_v5, %v1409_v22  ;;  %v624_v7 = vadd.f32 %v535_v45, %v349_v59  ;;  %v1084_v57 = vrot.slane %v974_v50, 1  ;;  %v4426_v42 = vmul.f32 %v4340_v0, %v5157_v26  ;;  %5179 = vst [vmem:[#allocation7_spill] sm:$0xff] %v4440_v47 }
 0x11f   : > { %5178 = vst [vmem:[#allocation5_spill] sm:$0xff] %v4420_v39  ;;  %v778_v6 = vsel %vm740_vm2, %v776_v19, %v5002_v14  ;;  %v5001_v60 = vrot.slane %v4420_v39, 1  ;;  %v1326_v30 = vrot.slane %v1216_v46, 2  ;;  %v1451_v8 = vmul.f32 %v2552_v21, %v4356_v54 }
 0x120   : > { %v1717_v48 = vadd.f32 %v1616_v18, %v1475_v36  ;;  %v867_v23 = vadd.f32 %v778_v6, %v624_v7  ;;  %v5008_v5 = vrot.slane %v4426_v42, 2  ;;  %v1524_v59 = vmul.f32 %v2552_v21, %v4363_v41  ;;  %v4449_v18 = vld [vmem:[%s4826_s1 + $0x8] ss:$0 sm:$0xff] }
 0x121   : > { %v1086_v22 = vsel %vm497_vm1, %v1084_v57, %v5001_v60  ;;  %v4444_v19 = vmul.f32 %v4440_v47, %v4363_v41  ;;  %v1766_v50 = vmul.f32 %v4449_v18, %v2552_v21  ;;  %v4454_v45 = vmul.f32 %v4449_v18, %v4440_v47  ;;  %v2555_v47 = vld [vmem:[%s2653_s18 + $0x118] sm:$0x3] }
 0x122   : > { %v1959_v46 = vadd.f32 %v1858_v10, %v1717_v48  ;;  %v933_v36 = vadd.f32 %v901_v20, %v867_v23  ;;  %v1328_v7 = vsel %vm740_vm2, %v1326_v30, %v5008_v5  ;;  %v1634_v57 = vrot.slane %v1524_v59, 1 }
 0x123   : > { %v5007_v6 = vrot.slane %v4444_v19, 1  ;;  %v1876_v60 = vrot.slane %v1766_v50, 2  ;;  %v5006_v14 = vrot.slane %v4454_v45, 2  ;;  %v358_v39 = vmul.f32 %v4279_v38, %v4143_v32 }
 0x124   : > { %v1995_v21 = vadd.f32 %v3664_v52, %v1959_v46  ;;  %v1175_v31 = vadd.f32 %v1086_v22, %v933_v36  ;;  %v436_v23 = vmul.f32 %v2555_v47, %v4290_v37  ;;  %v679_v48 = vmul.f32 %v2555_v47, %v4304_v4 }
 0x125   : > { %v1636_v30 = vsel %vm497_vm1, %v1634_v57, %v5007_v6  ;;  %v1878_v10 = vsel %vm740_vm2, %v1876_v60, %v5006_v14  ;;  %v910_v32 = vmul.f32 %v4314_v11, %v5170_v55  ;;  %v988_v52 = vmul.f32 %v4325_v58, %v3998_v9  ;;  %v2556_v60 = vld [vmem:[%s2653_s18 + $0x148] sm:$0x3] }
 0x126   : > { %2447 = vmatmul.msk.f32.gmra.mxu0 %vm2026_vm3, %v1995_v21  ;;  %v1417_v20 = vadd.f32 %v1328_v7, %v1175_v31  ;;  %v556_v59 = vrot.slane %v436_v23, 1  ;;  %v799_v22 = vrot.slane %v679_v48, 2  ;;  %v1230_v47 = vmul.f32 %v4340_v0, %v3998_v9 }
 0x127   : > { %v1107_v50 = vrot.slane %v988_v52, 1  ;;  %v1460_v46 = vmul.f32 %v4356_v54, %v4190_v61  ;;  %v1538_v36 = vmul.f32 %v2556_v60, %v4363_v41  ;;  %v1780_v55 = vmul.f32 %v2556_v60, %v4449_v18 }
 0x128   : > { %v1483_v57 = vadd.f32 %v1451_v8, %v1417_v20  ;;  %v5180_v14 = vrot.slane %v4147_v13, 1  ;;  %v5181_v7 = vrot.slane %v4152_v33, 2  ;;  %v1349_v21 = vrot.slane %v1230_v47, 2  ;;  %v2557_v20 = vld [vmem:[%s2653_s18 + $0x178] sm:$0x3] }
 0x129   : > { %v5182_v48 = vrot.slane %v4168_v40, 1  ;;  %v1657_v52 = vrot.slane %v1538_v36, 1  ;;  %v1899_v6 = vrot.slane %v1780_v55, 2  ;;  %v5183_v8 = vrot.slane %v4179_v3, 2 }
 0x12a   : > { %v557_v31 = vsel %vm497_vm1, %v5180_v14, %v556_v59  ;;  %v800_v9 = vsel %vm740_vm2, %v5181_v7, %v799_v22  ;;  %v1725_v5 = vadd.f32 %v1636_v30, %v1483_v57  ;;  %v366_v14 = vmul.f32 %v4279_v38, %v4213_v27  ;;  %v332_v30 = vld [vmem:[%s2653_s18 + $0x1a8] sm:$0x3] }
 0x12b   : > { %v633_v23 = vadd.f32 %v557_v31, %v358_v39  ;;  %v1108_v61 = vsel %vm497_vm1, %v5182_v48, %v1107_v50  ;;  %v1350_v13 = vsel %vm740_vm2, %v5183_v8, %v1349_v21  ;;  %v448_v33 = vmul.f32 %v2557_v20, %v4290_v37 }
 0x12c   : > { %v5184_v39 = vrot.slane %v4194_v44, 1  ;;  %v5185_v22 = vrot.slane %v4199_v56, 2  ;;  %v691_v3 = vmul.f32 %v2557_v20, %v4304_v4  ;;  %v1967_v50 = vadd.f32 %v1878_v10, %v1725_v5  ;;  %v4537_v20 = vpop.f32.mrf.mxu0 }
 0x12d   : > { %v876_v59 = vadd.f32 %v800_v9, %v633_v23  ;;  %v576_v60 = vrot.slane %v448_v33, 1  ;;  %v918_v27 = vmul.f32 %v4314_v11, %v3782_v49  ;;  %v1000_v36 = vmul.f32 %v4325_v58, %v4027_v25 }
 0x12e   : > { %v1658_v40 = vsel %vm497_vm1, %v5184_v39, %v1657_v52  ;;  %v1900_v47 = vsel %vm740_vm2, %v5185_v22, %v1899_v6  ;;  %v819_v57 = vrot.slane %v691_v3, 2  ;;  %v1242_v44 = vmul.f32 %v4340_v0, %v4027_v25  ;;  %v4520_v6 = vld [vmem:[%s4827_s2] ss:$0 sm:$0xff]  ;;  %v2559_v39 = vld [vmem:[%s2653_s18 + $0x58] sm:$0x3]  ;;  %v4546_v22 = vpop.f32.mrf.mxu2  ;;  %v4548_v3 = vpop.f32.mrf.mxu3 }
 0x12f   : > { %v942_v55 = vadd.f32 %v910_v32, %v876_v59  ;;  %v1468_v56 = vmul.f32 %v4356_v54, %v4235_v62  ;;  %v2003_v5 = vadd.f32 %v4520_v6, %v1967_v50  ;;  %v5186_v49 = vrot.slane %v4217_v15, 1 }
 0x130   : > { %v1127_v31 = vrot.slane %v1000_v36, 1  ;;  %v1550_v32 = vmul.f32 %v4363_v41, %v332_v30  ;;  %v5187_v9 = vrot.slane %v4222_v43, 2  ;;  %v1369_v21 = vrot.slane %v1242_v44, 2 }
 0x131   : > { %v577_v10 = vsel %vm497_vm1, %v5186_v49, %v576_v60  ;;  %v1184_v7 = vadd.f32 %v1108_v61, %v942_v55  ;;  %2455 = vmatmul.msk.f32.gmra.mxu1 %vm2026_vm3, %v2003_v5  ;;  %v5188_v23 = vrot.slane %v4241_v16, 1  ;;  %v1792_v52 = vmul.f32 %v4449_v18, %v332_v30  ;;  %v4539_v61 = vpop.f32.mrf.mxu1 }
 0x132   : > { %v641_v25 = vadd.f32 %v577_v10, %v366_v14  ;;  %v820_v62 = vsel %vm740_vm2, %v5187_v9, %v819_v57  ;;  %v1677_v15 = vrot.slane %v1550_v32, 1  ;;  %v342_v8 = vmul.f32 %v4294_v12, %v4279_v38 }
 0x133   : > { %v1128_v48 = vsel %vm497_vm1, %v5188_v23, %v1127_v31  ;;  %v1426_v43 = vadd.f32 %v1350_v13, %v1184_v7  ;;  %v5189_v33 = vrot.slane %v4253_v63, 2  ;;  %v412_v16 = vmul.f32 %v2559_v39, %v4290_v37 }
 0x134   : > { %v884_v14 = vadd.f32 %v820_v62, %v641_v25  ;;  %v5190_v30 = vrot.slane %v4261_v2, 1  ;;  %v1919_v50 = vrot.slane %v1792_v52, 2  ;;  %v655_v60 = vmul.f32 %v2559_v39, %v4304_v4  ;;  %v2560_v62 = vld [vmem:[%s2653_s18 + $0x88] sm:$0x3] }
 0x135   : > { %v1370_v59 = vsel %vm740_vm2, %v5189_v33, %v1369_v21  ;;  %v894_v13 = vmul.f32 %v4314_v11, %v3884_v35  ;;  %v1492_v63 = vadd.f32 %v1460_v46, %v1426_v43  ;;  %v516_v55 = vrot.slane %v412_v16, 1  ;;  %v2147_v43 = vpop.f32.mrf.mxu0 }
 0x136   : > { %v1678_v12 = vsel %vm497_vm1, %v5190_v30, %v1677_v15  ;;  %v950_v36 = vadd.f32 %v918_v27, %v884_v14  ;;  %v964_v57 = vmul.f32 %v4325_v58, %v4082_v24  ;;  %v5191_v44 = vrot.slane %v4273_v29, 2  ;;  %v4587_v16 = vpop.f32.mrf.mxu2  ;;  %v4589_v30 = vpop.f32.mrf.mxu3 }
 0x137   : > { %v759_v2 = vrot.slane %v655_v60, 2  ;;  %v1206_v49 = vmul.f32 %v4340_v0, %v4082_v24  ;;  %v1444_v10 = vmul.f32 %v4370_v51, %v4356_v54  ;;  %v1734_v31 = vadd.f32 %v1658_v40, %v1492_v63 }
 0x138   : > { %v1920_v5 = vsel %vm740_vm2, %v5191_v44, %v1919_v50  ;;  %v1192_v35 = vadd.f32 %v1128_v48, %v950_v36  ;;  %v5192_v46 = vrot.slane %v4298_v17, 1  ;;  %v1067_v32 = vrot.slane %v964_v57, 1  ;;  %v5196_v50 = vld [vmem:[#allocation12_spill] sm:$0xff]  ;;  %v5198_v36 = vld [vmem:[#allocation10_spill] sm:$0xff]  ;;  %v5200_v44 = vld [vmem:[#allocation11_spill] sm:$0xff] }
 0x139   : > { %v5193_v25 = vrot.slane %v4309_v1, 2  ;;  %v1309_v9 = vrot.slane %v1206_v49, 2  ;;  %v1514_v24 = vmul.f32 %v2560_v62, %v4363_v41  ;;  %v1976_v21 = vadd.f32 %v1900_v47, %v1734_v31  ;;  %v4582_v14 = vpop.f32.mrf.mxu1 }
 0x13a   : > { %v517_v27 = vsel %vm497_vm1, %v5192_v46, %v516_v55  ;;  %v1434_v23 = vadd.f32 %v1370_v59, %v1192_v35  ;;  %v5194_v51 = vrot.slane %v4332_v34, 1  ;;  %v1756_v17 = vmul.f32 %v2560_v62, %v4449_v18  ;;  %v2561_v59 = vld [vmem:[%s2653_s18 + $0xb8] sm:$0x3] }
 0x13b   : > { %v617_v7 = vadd.f32 %v517_v27, %v342_v8  ;;  %v760_v29 = vsel %vm740_vm2, %v5193_v25, %v759_v2  ;;  %v5195_v15 = vrot.slane %v4346_v28, 2  ;;  %v1617_v52 = vrot.slane %v1514_v24, 1  ;;  %v4623_v24 = vld [vmem:[%s4830_s5] ss:$0 sm:$0xff] }
 0x13c   : > { %v1068_v40 = vsel %vm497_vm1, %v5194_v51, %v1067_v32  ;;  %v350_v8 = vmul.f32 %v4390_v53, %v4279_v38  ;;  %v2012_v47 = vadd.f32 %v4520_v6, %v1976_v21  ;;  %v1500_v33 = vadd.f32 %v1468_v56, %v1434_v23  ;;  %v5206_v21 = vld [vmem:[#allocation5_spill] sm:$0xff] }
 0x13d   : > { %v860_v48 = vadd.f32 %v760_v29, %v617_v7  ;;  %v1310_v1 = vsel %vm740_vm2, %v5195_v15, %v1309_v9  ;;  %v1859_v34 = vrot.slane %v1756_v17, 2  ;;  %v424_v39 = vmul.f32 %v2561_v59, %v4290_v37 }
 0x13e   : > { %v5197_v60 = vrot.slane %v5196_v50, 1  ;;  %v667_v38 = vmul.f32 %v2561_v59, %v4304_v4  ;;  %v902_v53 = vmul.f32 %v4314_v11, %v5157_v26  ;;  %2464 = vmatmul.msk.f32.gmra.mxu2 %vm2026_vm3, %v2012_v47  ;;  %v1742_v56 = vadd.f32 %v1678_v12, %v1500_v33  ;;  %v5201_v4 = vld [vmem:[#allocation7_spill] sm:$0xff]  ;;  %v4610_v26 = vld [vmem:[%s4829_s4] ss:$0 sm:$0xff]  ;;  %v2150_v47 = vpop.f32.mrf.mxu0 }
 0x13f   : > { %v926_v28 = vadd.f32 %v894_v13, %v860_v48  ;;  %v5199_v37 = vrot.slane %v5198_v36, 2  ;;  %v536_v57 = vrot.slane %v424_v39, 1  ;;  %v976_v13 = vmul.f32 %v4325_v58, %v5200_v44  ;;  %v5202_v12 = vld [vmem:[#allocation15_spill] sm:$0xff] }
 0x140   : > { %v1618_v63 = vsel %vm497_vm1, %v5197_v60, %v1617_v52  ;;  %v779_v49 = vrot.slane %v667_v38, 2  ;;  %v1218_v31 = vmul.f32 %v4340_v0, %v5200_v44  ;;  %v1452_v35 = vmul.f32 %v5201_v4, %v4356_v54  ;;  %v2562_v58 = vld [vmem:[%s2653_s18 + $0xe8] sm:$0x3]  ;;  %v5204_v0 = vld [vmem:[#allocation2_spill] sm:$0xff] }
 0x141   : > { %v1860_v55 = vsel %vm740_vm2, %v5199_v37, %v1859_v34  ;;  %v1168_v2 = vadd.f32 %v1068_v40, %v926_v28  ;;  %v1984_v11 = vadd.f32 %v1920_v5, %v1742_v56  ;;  %v5203_v46 = vrot.slane %v5202_v12, 1  ;;  %v2198_v34 = vpop.f32.mrf.mxu2  ;;  %v2174_v56 = vpop.f32.mrf.mxu1 }
 0x142   : > { %v1087_v32 = vrot.slane %v976_v13, 1  ;;  %v1526_v7 = vmul.f32 %v2562_v58, %v4363_v41  ;;  %v5205_v9 = vrot.slane %v5204_v0, 2  ;;  %v1329_v62 = vrot.slane %v1218_v31, 2 }
 0x143   : > { %v537_v27 = vsel %vm497_vm1, %v5203_v46, %v536_v57  ;;  %v1410_v25 = vadd.f32 %v1310_v1, %v1168_v2  ;;  %v2020_v5 = vadd.f32 %v4520_v6, %v1984_v11  ;;  %v5207_v23 = vrot.slane %v5206_v21, 1 }
 0x144   : > { %v625_v29 = vadd.f32 %v537_v27, %v350_v8  ;;  %v780_v54 = vsel %vm740_vm2, %v5205_v9, %v779_v49  ;;  %v1637_v40 = vrot.slane %v1526_v7, 1  ;;  %v1768_v41 = vmul.f32 %v2562_v58, %v4449_v18  ;;  %v4638_v8 = vld [vmem:[%s4831_s6] ss:$0 sm:$0xff] }
 0x145   : > { %v1088_v51 = vsel %vm497_vm1, %v5207_v23, %v1087_v32  ;;  %v1476_v17 = vadd.f32 %v1444_v10, %v1410_v25  ;;  %v5208_v15 = vrot.slane %v4426_v42, 2  ;;  %v2145_v52 = vadd.f32 %v4610_v26, %v4537_v20  ;;  %2472 = vmatmul.msk.f32.gmra.mxu3 %vm2026_vm3, %v2020_v5 }
 0x146   : > { %v868_v48 = vadd.f32 %v780_v54, %v625_v29  ;;  %v5209_v33 = vrot.slane %v4444_v19, 1  ;;  %v1879_v10 = vrot.slane %v1768_v41, 2  ;;  %v2169_v42 = vadd.f32 %v4610_v26, %v4539_v61  ;;  %v2153_v9 = vpop.f32.mrf.mxu0 }
 0x147   : > { %v1330_v1 = vsel %vm740_vm2, %v5208_v15, %v1329_v62  ;;  %v1718_v59 = vadd.f32 %v1618_v63, %v1476_v17  ;;  %v2244_v39 = vmul.f32 %v4623_v24, %v2145_v52  ;;  %v2193_v28 = vadd.f32 %v4610_v26, %v4546_v22  ;;  %v2222_v63 = vpop.f32.mrf.mxu3 }
 0x148   : > { %v1638_v18 = vsel %vm497_vm1, %v5209_v33, %v1637_v40  ;;  %v934_v20 = vadd.f32 %v902_v53, %v868_v48  ;;  %v5210_v50 = vrot.slane %v4454_v45, 2  ;;  %v2252_v60 = vmul.f32 %v4623_v24, %v2169_v42 }
 0x149   : > { %v2217_v38 = vadd.f32 %v4610_v26, %v4548_v3  ;;  %v2148_v61 = vadd.f32 %v4610_v26, %v2147_v43  ;;  %v1960_v53 = vadd.f32 %v1860_v55, %v1718_v59  ;;  %v2280_v37 = vadd.f32 %v4638_v8, %v2244_v39  ;;  %v2177_v52 = vpop.f32.mrf.mxu1 }
 0x14a   : > { %v1880_v19 = vsel %vm740_vm2, %v5210_v50, %v1879_v10  ;;  %v1176_v36 = vadd.f32 %v1088_v51, %v934_v20  ;;  %v2260_v57 = vmul.f32 %v4623_v24, %v2193_v28  ;;  %v2288_v45 = vadd.f32 %v4638_v8, %v2252_v60 }
 0x14b   : > { %v2268_v22 = vmul.f32 %v4623_v24, %v2217_v38  ;;  %v2245_v3 = vmul.f32 %v4623_v24, %v2148_v61  ;;  %v2172_v43 = vadd.f32 %v4610_v26, %v4582_v14  ;;  %v1996_v55 = vadd.f32 %v4520_v6, %v1960_v53 }
 0x14c   : > { %v1418_v44 = vadd.f32 %v1330_v1, %v1176_v36  ;;  %v2312_v13 = vmax.f32 %v2280_v37, 0.0  ;;  %v2296_v2 = vadd.f32 %v4638_v8, %v2260_v57  ;;  %v2320_v49 = vmax.f32 %v2288_v45, 0.0 }
 0x14d   : > { %v2304_v31 = vadd.f32 %v4638_v8, %v2268_v22  ;;  %v2281_v4 = vadd.f32 %v4638_v8, %v2245_v3  ;;  %v2253_v11 = vmul.f32 %v4623_v24, %v2172_v43  ;;  %2448 = vmatmul.msk.f32.gmra.mxu0 %vm2026_vm3, %v1996_v55  ;;  %v2196_v46 = vadd.f32 %v4610_v26, %v4587_v16 }
 0x14e   : > { %v1484_v12 = vadd.f32 %v1452_v35, %v1418_v44  ;;  %2345 = vst.msk [vmem:[%s4662_s15] sm:$0xff] %vm2344_vm4, %v2312_v13  ;;  %v2328_v14 = vmax.f32 %v2296_v2, 0.0  ;;  %v2220_v27 = vadd.f32 %v4610_v26, %v4589_v30  ;;  %v2151_v25 = vadd.f32 %v4610_v26, %v2150_v47  ;;  %v2201_v35 = vpop.f32.mrf.mxu2 }
 0x14f   : > { %2353 = vst.msk [vmem:[%s4662_s15 + $0x40] sm:$0xff] %vm2344_vm4, %v2320_v49  ;;  %v2336_v32 = vmax.f32 %v2304_v31, 0.0  ;;  %v2313_v58 = vmax.f32 %v2281_v4, 0.0  ;;  %v2289_v7 = vadd.f32 %v4638_v8, %v2253_v11  ;;  %v2261_v0 = vmul.f32 %v4623_v24, %v2196_v46  ;;  %v2225_v47 = vpop.f32.mrf.mxu3 }
 0x150   : > { %v1726_v29 = vadd.f32 %v1638_v18, %v1484_v12  ;;  %2361 = vst.msk [vmem:[%s4662_s15 + $0x80] sm:$0xff] %vm2344_vm4, %v2328_v14  ;;  %v2269_v16 = vmul.f32 %v4623_v24, %v2220_v27  ;;  %v2175_v30 = vadd.f32 %v4610_v26, %v2174_v56  ;;  %v2246_v62 = vmul.f32 %v4623_v24, %v2151_v25 }
 0x151   : > { %2369 = vst.msk [vmem:[%s4662_s15 + $0xc0] sm:$0xff] %vm2344_vm4, %v2336_v32  ;;  %v2321_v54 = vmax.f32 %v2289_v7, 0.0  ;;  %v2199_v5 = vadd.f32 %v4610_v26, %v2198_v34  ;;  %v2223_v21 = vadd.f32 %v4610_v26, %v2222_v63  ;;  %v2297_v51 = vadd.f32 %v4638_v8, %v2261_v0 }
 0x152   : > { %v1968_v23 = vadd.f32 %v1880_v19, %v1726_v29  ;;  %2346 = vst.msk [vmem:[%s4662_s15 + $0x8] sm:$0xff] %vm2344_vm4, %v2313_v58  ;;  %v2305_v40 = vadd.f32 %v4638_v8, %v2269_v16  ;;  %v2254_v41 = vmul.f32 %v4623_v24, %v2175_v30  ;;  %v2282_v17 = vadd.f32 %v4638_v8, %v2246_v62 }
 0x153   : > { %2354 = vst.msk [vmem:[%s4662_s15 + $0x48] sm:$0xff] %vm2344_vm4, %v2321_v54  ;;  %v2262_v48 = vmul.f32 %v4623_v24, %v2199_v5  ;;  %v2270_v15 = vmul.f32 %v4623_v24, %v2223_v21  ;;  %v2154_v1 = vadd.f32 %v4610_v26, %v2153_v9  ;;  %v2329_v18 = vmax.f32 %v2297_v51, 0.0 }
 0x154   : > { %v2004_v33 = vadd.f32 %v4520_v6, %v1968_v23  ;;  %v2337_v10 = vmax.f32 %v2305_v40, 0.0  ;;  %v2290_v42 = vadd.f32 %v4638_v8, %v2254_v41  ;;  %v2314_v34 = vmax.f32 %v2282_v17, 0.0 }
 0x155   : > { %v2298_v59 = vadd.f32 %v4638_v8, %v2262_v48  ;;  %v2306_v20 = vadd.f32 %v4638_v8, %v2270_v15  ;;  %v2247_v39 = vmul.f32 %v4623_v24, %v2154_v1  ;;  %2362 = vst.msk [vmem:[%s4662_s15 + $0x88] sm:$0xff] %vm2344_vm4, %v2329_v18  ;;  %v2178_v6 = vadd.f32 %v4610_v26, %v2177_v52  ;;  %v2156_v12 = vpop.f32.mrf.mxu0 }
 0x156   : > { %2456 = vmatmul.msk.f32.gmra.mxu1 %vm2026_vm3, %v2004_v33  ;;  %v2322_v28 = vmax.f32 %v2290_v42, 0.0  ;;  %v2202_v50 = vadd.f32 %v4610_v26, %v2201_v35  ;;  %v2226_v19 = vadd.f32 %v4610_v26, %v2225_v47  ;;  %2370 = vst.msk [vmem:[%s4662_s15 + $0xc8] sm:$0xff] %vm2344_vm4, %v2337_v10  ;;  %v2204_v56 = vpop.f32.mrf.mxu2  ;;  %v2157_v14 = vadd.f32 %v4610_v26, %v2156_v12 }
 0x157   : > { %v2330_v60 = vmax.f32 %v2298_v59, 0.0  ;;  %v2338_v38 = vmax.f32 %v2306_v20, 0.0  ;;  %v2283_v61 = vadd.f32 %v4638_v8, %v2247_v39  ;;  %2347 = vst.msk [vmem:[%s4662_s15 + $0x10] sm:$0xff] %vm2344_vm4, %v2314_v34  ;;  %v2255_v63 = vmul.f32 %v4623_v24, %v2178_v6  ;;  %v2228_v49 = vpop.f32.mrf.mxu3 }
 0x158   : > { %v2263_v53 = vmul.f32 %v4623_v24, %v2202_v50  ;;  %v2271_v36 = vmul.f32 %v4623_v24, %v2226_v19  ;;  %v2205_v37 = vadd.f32 %v4610_v26, %v2204_v56  ;;  %2355 = vst.msk [vmem:[%s4662_s15 + $0x50] sm:$0xff] %vm2344_vm4, %v2322_v28  ;;  %v2229_v4 = vadd.f32 %v4610_v26, %v2228_v49 }
 0x159   : > { %v2315_v57 = vmax.f32 %v2283_v61, 0.0  ;;  %2363 = vst.msk [vmem:[%s4662_s15 + $0x90] sm:$0xff] %vm2344_vm4, %v2330_v60  ;;  %v2291_v45 = vadd.f32 %v4638_v8, %v2255_v63  ;;  %v2248_v27 = vmul.f32 %v4623_v24, %v2157_v14 }
 0x15a   : > { %v2299_v22 = vadd.f32 %v4638_v8, %v2263_v53  ;;  %v2307_v3 = vadd.f32 %v4638_v8, %v2271_v36  ;;  %v2264_v43 = vmul.f32 %v4623_v24, %v2205_v37  ;;  %2371 = vst.msk [vmem:[%s4662_s15 + $0xd0] sm:$0xff] %vm2344_vm4, %v2338_v38  ;;  %v2272_v11 = vmul.f32 %v4623_v24, %v2229_v4 }
 0x15b   : > { %2348 = vst.msk [vmem:[%s4662_s15 + $0x18] sm:$0xff] %vm2344_vm4, %v2315_v57  ;;  %v2323_v55 = vmax.f32 %v2291_v45, 0.0  ;;  %v2284_v58 = vadd.f32 %v4638_v8, %v2248_v27 }
 0x15c   : > { %v2331_v44 = vmax.f32 %v2299_v22, 0.0  ;;  %v2339_v13 = vmax.f32 %v2307_v3, 0.0  ;;  %v2300_v2 = vadd.f32 %v4638_v8, %v2264_v43  ;;  %v2308_v46 = vadd.f32 %v4638_v8, %v2272_v11 }
 0x15d   : > { %2356 = vst.msk [vmem:[%s4662_s15 + $0x58] sm:$0xff] %vm2344_vm4, %v2323_v55  ;;  %v2316_v7 = vmax.f32 %v2284_v58, 0.0 }
 0x15e   : > { %v2332_v31 = vmax.f32 %v2300_v2, 0.0  ;;  %2364 = vst.msk [vmem:[%s4662_s15 + $0x98] sm:$0xff] %vm2344_vm4, %v2331_v44  ;;  %v2340_v32 = vmax.f32 %v2308_v46, 0.0 }
 0x15f   : > { %2372 = vst.msk [vmem:[%s4662_s15 + $0xd8] sm:$0xff] %vm2344_vm4, %v2339_v13 }
 0x160   : > { %2365 = vst.msk [vmem:[%s4662_s15 + $0xa0] sm:$0xff] %vm2344_vm4, %v2332_v31  ;;  %v2180_v25 = vpop.f32.mrf.mxu1 }
 0x161   : > { %2373 = vst.msk [vmem:[%s4662_s15 + $0xe0] sm:$0xff] %vm2344_vm4, %v2340_v32  ;;  %v2181_v35 = vadd.f32 %v4610_v26, %v2180_v25 }
 0x162   : > { %2349 = vst.msk [vmem:[%s4662_s15 + $0x20] sm:$0xff] %vm2344_vm4, %v2316_v7 }
 0x163   : > { %v2256_v29 = vmul.f32 %v4623_v24, %v2181_v35 }
 0x165   : > { %v2292_v0 = vadd.f32 %v4638_v8, %v2256_v29 }
 0x167   : > { %v2324_v16 = vmax.f32 %v2292_v0, 0.0 }
 0x169   : > { %2357 = vst.msk [vmem:[%s4662_s15 + $0x60] sm:$0xff] %vm2344_vm4, %v2324_v16 }
 0x173   : > { %v2207_v30 = vpop.f32.mrf.mxu2 }
 0x174   : > { %v2208_v9 = vadd.f32 %v4610_v26, %v2207_v30 }
 0x176   : > { %v2265_v54 = vmul.f32 %v4623_v24, %v2208_v9 }
 0x178   : > { %v2301_v62 = vadd.f32 %v4638_v8, %v2265_v54 }
 0x17a   : > { %v2231_v5 = vpop.f32.mrf.mxu3  ;;  %v2333_v23 = vmax.f32 %v2301_v62, 0.0 }
 0x17b   : > { %v2232_v51 = vadd.f32 %v4610_v26, %v2231_v5 }
 0x17c   : > { %2366 = vst.msk [vmem:[%s4662_s15 + $0xa8] sm:$0xff] %vm2344_vm4, %v2333_v23 }
 0x17d   : > { %v2159_v21 = vpop.f32.mrf.mxu0  ;;  %v2273_v41 = vmul.f32 %v4623_v24, %v2232_v51 }
 0x17e   : > { %v2160_v40 = vadd.f32 %v4610_v26, %v2159_v21 }
 0x17f   : > { %v2309_v48 = vadd.f32 %v4638_v8, %v2273_v41 }
 0x180   : > { %v2249_v17 = vmul.f32 %v4623_v24, %v2160_v40 }
 0x181   : > { %v2341_v1 = vmax.f32 %v2309_v48, 0.0 }
 0x182   : > { %v2285_v15 = vadd.f32 %v4638_v8, %v2249_v17 }
 0x183   : > { %2374 = vst.msk [vmem:[%s4662_s15 + $0xe8] sm:$0xff] %vm2344_vm4, %v2341_v1 }
 0x184   : > { %v2317_v52 = vmax.f32 %v2285_v15, 0.0 }
 0x185   : > { %v2183_v47 = vpop.f32.mrf.mxu1 }
 0x186   : > { %2350 = vst.msk [vmem:[%s4662_s15 + $0x28] sm:$0xff] %vm2344_vm4, %v2317_v52  ;;  %v2184_v33 = vadd.f32 %v4610_v26, %v2183_v47 }
 0x188   : > { %v2257_v18 = vmul.f32 %v4623_v24, %v2184_v33 }
 0x18a   : > { %v2293_v10 = vadd.f32 %v4638_v8, %v2257_v18 }
 0x18c   : > { %v2325_v42 = vmax.f32 %v2293_v10, 0.0 }
 0x18e   : > { %2358 = vst.msk [vmem:[%s4662_s15 + $0x68] sm:$0xff] %vm2344_vm4, %v2325_v42 }
 0x193   : > { %v2210_v34 = vpop.f32.mrf.mxu2 }
 0x194   : > { %v2211_v59 = vadd.f32 %v4610_v26, %v2210_v34 }
 0x196   : > { %v2266_v20 = vmul.f32 %v4623_v24, %v2211_v59 }
 0x198   : > { %v2302_v39 = vadd.f32 %v4638_v8, %v2266_v20 }
 0x19a   : > { %v2334_v28 = vmax.f32 %v2302_v39, 0.0 }
 0x19c   : > { %2367 = vst.msk [vmem:[%s4662_s15 + $0xb0] sm:$0xff] %vm2344_vm4, %v2334_v28 }
 0x19f   : > { %v2234_v6 = vpop.f32.mrf.mxu3 }
 0x1a0   : > { %v2235_v50 = vadd.f32 %v4610_v26, %v2234_v6 }
 0x1a2   : > { %v2274_v19 = vmul.f32 %v4623_v24, %v2235_v50 }
 0x1a3   : > { %v2162_v60 = vpop.f32.mrf.mxu0 }
 0x1a4   : > { %v2163_v38 = vadd.f32 %v4610_v26, %v2162_v60  ;;  %v2310_v61 = vadd.f32 %v4638_v8, %v2274_v19 }
 0x1a6   : > { %v2250_v56 = vmul.f32 %v4623_v24, %v2163_v38  ;;  %v2342_v63 = vmax.f32 %v2310_v61, 0.0 }
 0x1a8   : > { %v2286_v53 = vadd.f32 %v4638_v8, %v2250_v56  ;;  %2375 = vst.msk [vmem:[%s4662_s15 + $0xf0] sm:$0xff] %vm2344_vm4, %v2342_v63 }
 0x1aa   : > { %v2318_v36 = vmax.f32 %v2286_v53, 0.0 }
 0x1ac   : > { %2351 = vst.msk [vmem:[%s4662_s15 + $0x30] sm:$0xff] %vm2344_vm4, %v2318_v36 }
 0x1ae   : > { %v2186_v37 = vpop.f32.mrf.mxu1 }
 0x1af   : > { %v2187_v57 = vadd.f32 %v4610_v26, %v2186_v37 }
 0x1b1   : > { %v2258_v45 = vmul.f32 %v4623_v24, %v2187_v57 }
 0x1b3   : > { %v2294_v22 = vadd.f32 %v4638_v8, %v2258_v45 }
 0x1b5   : > { %v2326_v3 = vmax.f32 %v2294_v22, 0.0 }
 0x1b7   : > { %2359 = vst.msk [vmem:[%s4662_s15 + $0x70] sm:$0xff] %vm2344_vm4, %v2326_v3 }
 0x1c1   : > { %v2213_v43 = vpop.f32.mrf.mxu2 }
 0x1c2   : > { %v2214_v55 = vadd.f32 %v4610_v26, %v2213_v43 }
 0x1c4   : > { %v2267_v44 = vmul.f32 %v4623_v24, %v2214_v55 }
 0x1c6   : > { %v2303_v13 = vadd.f32 %v4638_v8, %v2267_v44 }
 0x1c8   : > { %v2237_v2 = vpop.f32.mrf.mxu3  ;;  %v2335_v31 = vmax.f32 %v2303_v13, 0.0 }
 0x1c9   : > { %v2238_v4 = vadd.f32 %v4610_v26, %v2237_v2 }
 0x1ca   : > { %v2165_v49 = vpop.f32.mrf.mxu0  ;;  %2368 = vst.msk [vmem:[%s4662_s15 + $0xb8] sm:$0xff] %vm2344_vm4, %v2335_v31 }
 0x1cb   : > { %v2166_v11 = vadd.f32 %v4610_v26, %v2165_v49  ;;  %v2275_v12 = vmul.f32 %v4623_v24, %v2238_v4 }
 0x1cd   : > { %v2251_v14 = vmul.f32 %v4623_v24, %v2166_v11  ;;  %v2311_v46 = vadd.f32 %v4638_v8, %v2275_v12 }
 0x1cf   : > { %v2287_v27 = vadd.f32 %v4638_v8, %v2251_v14  ;;  %v2343_v32 = vmax.f32 %v2311_v46, 0.0 }
 0x1d1   : > { %v2319_v58 = vmax.f32 %v2287_v27, 0.0  ;;  %2376 = vst.msk [vmem:[%s4662_s15 + $0xf8] sm:$0xff] %vm2344_vm4, %v2343_v32 }
 0x1d3   : > { %v2189_v7 = vpop.f32.mrf.mxu1  ;;  %2352 = vst.msk [vmem:[%s4662_s15 + $0x38] sm:$0xff] %vm2344_vm4, %v2319_v58 }
 0x1d4   : > { %v2190_v25 = vadd.f32 %v4610_v26, %v2189_v7 }
 0x1d6   : > { %v2259_v35 = vmul.f32 %v4623_v24, %v2190_v25 }
 0x1d8   : > { %v2295_v29 = vadd.f32 %v4638_v8, %v2259_v35 }
 0x1da   : > { %v2327_v0 = vmax.f32 %v2295_v29, 0.0 }
 0x1dc   : > { %2360 = vst.msk [vmem:[%s4662_s15 + $0x78] sm:$0xff] %vm2344_vm4, %v2327_v0 }
 0x1dd PF: > { %s17_s24 = sadd.s32 1, %s2569_s24  }
 0x1de   : > { %p14_p4 = scmp.ge.s32.totalorder %s17_s24, 4  }
 0x1e0   :  { %16 = sbr.rel (!%p14_p4) target bundleno = 1 (0x1), region = 78 }

</bundles_post_ra>
